<compile_context>
chip_gen: v6e
topology: v6e:2x2x1
jax: 0.10.0
libtpu: 0.0.40
codegen_flags: <defaults>
</compile_context>

<pallas_src>
import functools

import numpy as np
import jax
import jax.numpy as jnp
from jax.experimental import pallas as pl
from jax.experimental.pallas import tpu as pltpu


def _round_up(v, m):
    return (v + m - 1) // m * m


# ------------------------------------------------------------------
# Kernel
# ------------------------------------------------------------------
# Operands (gate order i,f,g,o; all f32 unless the bf16 path is enabled):
#   x2d   : (Tp*Bp, D)   time-major, batch padded to Bp; row t*Bp+b == (t, b)
#   wih   : (D, 8H)      [W_ih_fwd | W_ih_bwd]
#   b     : (1, 8H)      combined b_ih + b_hh, [fwd | bwd]
#   whh_f : (H, 4H)      forward recurrent weights
#   whh_b : (H, 4H)      backward recurrent weights
#   wfc_f : (H, H)       fc_w rows 0:H   (final Linear, fwd half)
#   wfc_b : (H, H)       fc_w rows H:2H  (final Linear, bwd half)
#   bfc   : (1, H)
#   out   : (Bp, H)
# Scratch:
#   gx_sc : (Tp*Bp, 8H)  precomputed input projections (both directions),
#                        filled chunk-by-chunk across the grid.
def _bilstm_encoder_kernel(x_ref, wih_ref, b_ref, whh_f_ref, whh_b_ref,
                           wfc_f_ref, wfc_b_ref, bfc_ref, out_ref, gx_sc,
                           *, seq_len, unroll):
    c = pl.program_id(0)
    num_chunks = pl.num_programs(0)
    chunk_rows = x_ref.shape[0]          # chunk_t * Bp
    Bp, H = out_ref.shape
    G = 4 * H

    # ---- streaming preamble: project this chunk (both directions, bias folded).
    # The next chunk's x DMA overlaps this matmul via BlockSpec pipelining.
    gxc = (jnp.dot(x_ref[...], wih_ref[...], preferred_element_type=jnp.float32)
           + b_ref[...])
    row0 = pl.multiple_of(c * chunk_rows, chunk_rows)
    gx_sc[pl.ds(row0, chunk_rows), :] = gxc.astype(gx_sc.dtype)

    # ---- last chunk: serial bidirectional recurrence + fused Linear(2H -> H)
    @pl.when(c == num_chunks - 1)
    def _():
        whh_f = whh_f_ref[...]           # hoist weight loads out of the loop
        whh_b = whh_b_ref[...]

        def cell(gates, c_prev):
            # NOTE: for H < 128 these per-gate lane slices are not vreg
            # aligned (a few masked/select ops per step); a gate-major layout
            # would remove them if production H is small. For H % 128 == 0
            # they are plain aligned vreg reads.
            i = jax.nn.sigmoid(gates[:, 0 * H:1 * H])
            f = jax.nn.sigmoid(gates[:, 1 * H:2 * H])
            g = jnp.tanh(gates[:, 2 * H:3 * H])
            o = jax.nn.sigmoid(gates[:, 3 * H:4 * H])
            c_new = f * c_prev + i * g
            return o * jnp.tanh(c_new), c_new

        def step(t, carry):
            h_f, c_f, h_b, c_b = carry
            # Two independent per-direction dots (no zero block-diag waste,
            # no per-step concatenate); they pipeline back-to-back in the MXU.
            rec_f = jnp.dot(h_f, whh_f, preferred_element_type=jnp.float32)
            rec_b = jnp.dot(h_b, whh_b, preferred_element_type=jnp.float32)
            row_f = pl.multiple_of(t * Bp, Bp)                 # fwd: x[t]
            row_b = pl.multiple_of((seq_len - 1 - t) * Bp, Bp)  # bwd: x[T-1-t]
            gx_f = gx_sc[pl.ds(row_f, Bp), pl.ds(0, G)].astype(jnp.float32)
            gx_b = gx_sc[pl.ds(row_b, Bp), pl.ds(G, G)].astype(jnp.float32)
            h_f, c_f = cell(gx_f + rec_f, c_f)
            h_b, c_b = cell(gx_b + rec_b, c_b)
            return h_f, c_f, h_b, c_b

        z = jnp.zeros((Bp, H), jnp.float32)
        h_f, _, h_b, _ = jax.lax.fori_loop(0, seq_len, step, (z, z, z, z),
                                           unroll=unroll)

        # Fused final Linear on cat(h_fwd_final, h_bwd_final), split per half.
        out_ref[...] = (
            jnp.dot(h_f, wfc_f_ref[...], preferred_element_type=jnp.float32)
            + jnp.dot(h_b, wfc_b_ref[...], preferred_element_type=jnp.float32)
            + bfc_ref[...])


# ------------------------------------------------------------------
# Wrapper
# ------------------------------------------------------------------
@functools.partial(jax.jit, static_argnames=("chunk_t", "gx_dtype"))
def bilstm_encoder(x, params, *, chunk_t=None, gx_dtype=jnp.float32):
    """x: (B, T, D) -> (B, H). Matches BiLSTMEncoder.forward.

    chunk_t : timesteps streamed per grid step (default min(T, 64)).
    gx_dtype: storage dtype of the precomputed input projections; bfloat16
              halves the dominant VMEM buffer and the x/wih MXU-operand bytes
              (gate math stays f32) at a small accuracy cost.
    """
    B, T, D = x.shape
    H = params["whh_f"].shape[0]

    gx_dt = np.dtype(gx_dtype)
    low_precision = gx_dt.itemsize < 4
    mxu_dtype = jnp.bfloat16 if low_precision else jnp.float32

    # Batch padded to the sublane granule of gx_dtype so every per-timestep
    # (Bp, 4H) slab of gx_sc is tile-aligned (f32: 8 rows, bf16: 16 rows).
    granule = 16 if low_precision else 8
    Bp = _round_up(max(B, granule), granule)

    if chunk_t is None:
        chunk_t = min(T, 64)
    chunk_t = max(1, min(chunk_t, T))
    Tp = _round_up(T, chunk_t)
    num_chunks = Tp // chunk_t
    chunk_rows = chunk_t * Bp

    # Time-major, padded copy of x. (One extra HBM pass in the wrapper; could
    # be folded into the kernel with a per-chunk relayout if x is huge.)
    x_tbd = jnp.transpose(x, (1, 0, 2)).astype(mxu_dtype)        # (T, B, D)
    x_tbd = jnp.pad(x_tbd, ((0, Tp - T), (0, Bp - B), (0, 0)))
    x2d = x_tbd.reshape(Tp * Bp, D)

    # Weight packing: directions concatenated along columns for the input
    # projection; recurrent/fc weights kept per-direction (no zero padding).
    wih = jnp.concatenate([params["wih_f"], params["wih_b"]],
                          axis=1).astype(mxu_dtype)              # (D, 8H)
    b = jnp.concatenate([params["b_f"], params["b_b"]],
                        axis=0).reshape(1, 8 * H).astype(jnp.float32)
    whh_f = params["whh_f"].astype(jnp.float32)                  # (H, 4H)
    whh_b = params["whh_b"].astype(jnp.float32)                  # (H, 4H)
    wfc_f = params["fc_w"][:H, :].astype(jnp.float32)            # (H, H)
    wfc_b = params["fc_w"][H:, :].astype(jnp.float32)            # (H, H)
    bfc = params["fc_b"].reshape(1, H).astype(jnp.float32)

    # VMEM budget sized from the actual buffers (+ headroom), capped below
    # the physical limits.
    x_item = np.dtype(mxu_dtype).itemsize
    gx_bytes = Tp * Bp * 8 * H * gx_dt.itemsize
    stream_bytes = 2 * chunk_rows * D * x_item                  # dbl-buffered x
    weight_bytes = 2 * (D * 8 * H * x_item
                        + (8 * H + 8 * H * H + 2 * H * H + 2 * H) * 4)
    out_bytes = 2 * Bp * H * 4
    vmem_limit = int(gx_bytes + stream_bytes + weight_bytes + out_bytes
                     + (4 << 20))
    vmem_limit = min(max(vmem_limit, 16 << 20), 127 << 20)

    kernel = functools.partial(_bilstm_encoder_kernel,
                               seq_len=T, unroll=min(T, 8))

    out = pl.pallas_call(
        kernel,
        out_shape=jax.ShapeDtypeStruct((Bp, H), jnp.float32),
        grid_spec=pltpu.PrefetchScalarGridSpec(
            num_scalar_prefetch=0,
            grid=(num_chunks,),
            in_specs=[
                pl.BlockSpec((chunk_rows, D), lambda c: (c, 0)),   # streamed x
                pl.BlockSpec((D, 8 * H), lambda c: (0, 0)),        # wih (resident)
                pl.BlockSpec((1, 8 * H), lambda c: (0, 0)),        # b
                pl.BlockSpec((H, 4 * H), lambda c: (0, 0)),        # whh_f
                pl.BlockSpec((H, 4 * H), lambda c: (0, 0)),        # whh_b
                pl.BlockSpec((H, H), lambda c: (0, 0)),            # wfc_f
                pl.BlockSpec((H, H), lambda c: (0, 0)),            # wfc_b
                pl.BlockSpec((1, H), lambda c: (0, 0)),            # bfc
            ],
            out_specs=pl.BlockSpec((Bp, H), lambda c: (0, 0)),
            scratch_shapes=[pltpu.VMEM((Tp * Bp, 8 * H), gx_dtype)],
        ),
        compiler_params=pltpu.CompilerParams(
            dimension_semantics=("arbitrary",),
            vmem_limit_bytes=vmem_limit,
        ),
    )(x2d, wih, b, whh_f, whh_b, wfc_f, wfc_b, bfc)
    return out[:B]


# ------------------------------------------------------------------
# Pure-JAX reference (PyTorch semantics) for correctness check
# ------------------------------------------------------------------
def bilstm_encoder_ref(x, params):
    B, T, D = x.shape
    H = params["whh_f"].shape[0]

    def run(x_seq, wih, whh, bias):
        def step(carry, x_t):
            h, c = carry
            gates = x_t @ wih + h @ whh + bias
            i = jax.nn.sigmoid(gates[:, 0 * H:1 * H])
            f = jax.nn.sigmoid(gates[:, 1 * H:2 * H])
            g = jnp.tanh(gates[:, 2 * H:3 * H])
            o = jax.nn.sigmoid(gates[:, 3 * H:4 * H])
            c = f * c + i * g
            h = o * jnp.tanh(c)
            return (h, c), None
        init = (jnp.zeros((B, H), jnp.float32), jnp.zeros((B, H), jnp.float32))
        (h, _), _ = jax.lax.scan(step, init, x_seq)
        return h

    x_tbd = jnp.transpose(x, (1, 0, 2)).astype(jnp.float32)
    h_f = run(x_tbd, params["wih_f"], params["whh_f"], params["b_f"])
    h_b = run(x_tbd[::-1], params["wih_b"], params["whh_b"], params["b_b"])
    h = jnp.concatenate([h_f, h_b], axis=-1)
    return h @ params["fc_w"] + params["fc_b"]


def init_params(key, input_dim, hidden_dim, scale=0.1):
    D, H = input_dim, hidden_dim
    ks = jax.random.split(key, 8)
    r = lambda k, shape: scale * jax.random.normal(k, shape, jnp.float32)
    return {
        # PyTorch LSTM weights stored transposed, gate order i,f,g,o;
        # b_* is the combined bias (b_ih + b_hh).
        "wih_f": r(ks[0], (D, 4 * H)), "whh_f": r(ks[1], (H, 4 * H)), "b_f": r(ks[2], (4 * H,)),
        "wih_b": r(ks[3], (D, 4 * H)), "whh_b": r(ks[4], (H, 4 * H)), "b_b": r(ks[5], (4 * H,)),
        # nn.Linear(2H, H) stored transposed.
        "fc_w": r(ks[6], (2 * H, H)), "fc_b": r(ks[7], (H,)),
    }


# ------------------------------------------------------------------
if __name__ == "__main__":
    B, T, D, H = 2, 8, 16, 32

    key = jax.random.PRNGKey(0)
    k_x, k_p = jax.random.split(key)
    x = jax.random.normal(k_x, (B, T, D), jnp.float32)
    params = init_params(k_p, D, H)

    ref = bilstm_encoder_ref(x, params)

    # f32 path, chunk_t=4 -> 2 streamed chunks (exercises the pipelined grid).
    out = bilstm_encoder(x, params, chunk_t=4)
    jax.block_until_ready(out)
    assert out.shape == (B, H)
    err = float(jnp.max(jnp.abs(out - ref)))
    assert jnp.allclose(out, ref, atol=1e-4, rtol=1e-4), f"f32 max abs err {err}"

    # Reduced-precision path: bf16 gx_sc storage + bf16 x/wih MXU operands
    # (gate math stays f32); looser tolerance per the documented precision hit.
    out_bf16 = bilstm_encoder(x, params, chunk_t=4, gx_dtype=jnp.bfloat16)
    jax.block_until_ready(out_bf16)
    err_bf16 = float(jnp.max(jnp.abs(out_bf16 - ref)))
    assert jnp.allclose(out_bf16, ref, atol=5e-2, rtol=5e-2), \
        f"bf16 max abs err {err_bf16}"

    print("KERNEL_OK")
</pallas_src>

<mosaic_0001>
module attributes {stable_mosaic.version = 11 : i64} {
  func.func @_bilstm_encoder_kernel(%arg0: i32, %arg1: memref<32x16xf32, #tpu.memory_space<vmem>>, %arg2: memref<16x256xf32, #tpu.memory_space<vmem>>, %arg3: memref<1x256xf32, #tpu.memory_space<vmem>>, %arg4: memref<32x128xf32, #tpu.memory_space<vmem>>, %arg5: memref<32x128xf32, #tpu.memory_space<vmem>>, %arg6: memref<32x32xf32, #tpu.memory_space<vmem>>, %arg7: memref<32x32xf32, #tpu.memory_space<vmem>>, %arg8: memref<1x32xf32, #tpu.memory_space<vmem>>, %arg9: memref<8x32xf32, #tpu.memory_space<vmem>>, %arg10: memref<64x256xf32, #tpu.memory_space<vmem>>) attributes {dimension_semantics = [#tpu.dimension_semantics<arbitrary>], iteration_bounds = array<i64: 2>, scalar_prefetch = 0 : i64, scratch_operands = 1 : i64, tpu.core_type = #tpu.core_type<tc>, window_params = [{transform_indices = @transform_0, window_bounds = array<i64: 32, 16>}, {pipeline_mode = #tpu.pipeline_mode<synchronous>, transform_indices = @transform_1, window_bounds = array<i64: 16, 256>}, {pipeline_mode = #tpu.pipeline_mode<synchronous>, transform_indices = @transform_2, window_bounds = array<i64: 1, 256>}, {pipeline_mode = #tpu.pipeline_mode<synchronous>, transform_indices = @transform_3, window_bounds = array<i64: 32, 128>}, {pipeline_mode = #tpu.pipeline_mode<synchronous>, transform_indices = @transform_4, window_bounds = array<i64: 32, 128>}, {pipeline_mode = #tpu.pipeline_mode<synchronous>, transform_indices = @transform_5, window_bounds = array<i64: 32, 32>}, {pipeline_mode = #tpu.pipeline_mode<synchronous>, transform_indices = @transform_6, window_bounds = array<i64: 32, 32>}, {pipeline_mode = #tpu.pipeline_mode<synchronous>, transform_indices = @transform_7, window_bounds = array<i64: 1, 32>}, {pipeline_mode = #tpu.pipeline_mode<synchronous>, transform_indices = @transform_8, window_bounds = array<i64: 8, 32>}]} {
    %c0 = arith.constant 0 : index
    %c0_0 = arith.constant 0 : index
    %0 = vector.load %arg1[%c0, %c0_0] : memref<32x16xf32, #tpu.memory_space<vmem>>, vector<32x16xf32>
    %c0_1 = arith.constant 0 : index
    %c0_2 = arith.constant 0 : index
    %1 = vector.load %arg2[%c0_1, %c0_2] : memref<16x256xf32, #tpu.memory_space<vmem>>, vector<16x256xf32>
    %cst = arith.constant dense<0.000000e+00> : vector<32x256xf32>
    %2 = tpu.matmul %0, %1, %cst {dimension_numbers = #tpu.dot_dimension_numbers<[1], [0], [0], [1], [0, 0, 1, 1], [], []>} : vector<32x16xf32>, vector<16x256xf32>, vector<32x256xf32> -> vector<32x256xf32>
    %c0_3 = arith.constant 0 : index
    %c0_4 = arith.constant 0 : index
    %3 = vector.load %arg3[%c0_3, %c0_4] : memref<1x256xf32, #tpu.memory_space<vmem>>, vector<1x256xf32>
    %4 = vector.broadcast %3 : vector<1x256xf32> to vector<32x256xf32>
    %5 = arith.addf %2, %4 : vector<32x256xf32>
    %c32_i32 = arith.constant 32 : i32
    %6 = arith.muli %arg0, %c32_i32 : i32
    %7 = tpu.assume_multiple %6, 32 : i32
    %8 = arith.index_cast %7 : i32 to index
    %c0_5 = arith.constant 0 : index
    %9 = vector.load %arg10[%8, %c0_5] : memref<64x256xf32, #tpu.memory_space<vmem>>, vector<32x256xf32>
    tpu.vector_store %arg10[%8, %c0_5], %5 {strides = array<i32>} : memref<64x256xf32, #tpu.memory_space<vmem>>, vector<32x256xf32>,
    %c1_i32 = arith.constant 1 : i32
    %10 = arith.cmpi eq, %arg0, %c1_i32 : i32
    %11 = arith.extui %10 : i1 to i32
    %c0_i32 = arith.constant 0 : i32
    %12 = arith.cmpi ne, %11, %c0_i32 : i32
    scf.if %12 {
      %c0_6 = arith.constant 0 : index
      %c0_7 = arith.constant 0 : index
      %13 = vector.load %arg4[%c0_6, %c0_7] : memref<32x128xf32, #tpu.memory_space<vmem>>, vector<32x128xf32>
      %c0_8 = arith.constant 0 : index
      %c0_9 = arith.constant 0 : index
      %14 = vector.load %arg5[%c0_8, %c0_9] : memref<32x128xf32, #tpu.memory_space<vmem>>, vector<32x128xf32>
      %cst_10 = arith.constant 0.000000e+00 : f32
      %15 = vector.broadcast %cst_10 : f32 to vector<8x32xf32>
      %c0_i32_11 = arith.constant 0 : i32
      %cst_12 = arith.constant dense<0.000000e+00> : vector<8x128xf32>
      %16 = tpu.matmul %15, %13, %cst_12 {dimension_numbers = #tpu.dot_dimension_numbers<[1], [0], [0], [1], [0, 0, 1, 1], [], []>} : vector<8x32xf32>, vector<32x128xf32>, vector<8x128xf32> -> vector<8x128xf32>
      %cst_13 = arith.constant dense<0.000000e+00> : vector<8x128xf32>
      %17 = tpu.matmul %15, %14, %cst_13 {dimension_numbers = #tpu.dot_dimension_numbers<[1], [0], [0], [1], [0, 0, 1, 1], [], []>} : vector<8x32xf32>, vector<32x128xf32>, vector<8x128xf32> -> vector<8x128xf32>
      %c8_i32 = arith.constant 8 : i32
      %18 = arith.muli %c0_i32_11, %c8_i32 : i32
      %19 = tpu.assume_multiple %18, 8 : i32
      %c7_i32 = arith.constant 7 : i32
      %20 = arith.subi %c7_i32, %c0_i32_11 : i32
      %c8_i32_14 = arith.constant 8 : i32
      %21 = arith.muli %20, %c8_i32_14 : i32
      %22 = tpu.assume_multiple %21, 8 : i32
      %23 = arith.index_cast %19 : i32 to index
      %c0_15 = arith.constant 0 : index
      %24 = vector.load %arg10[%23, %c0_15] : memref<64x256xf32, #tpu.memory_space<vmem>>, vector<8x128xf32>
      %25 = arith.index_cast %22 : i32 to index
      %c128 = arith.constant 128 : index
      %26 = vector.load %arg10[%25, %c128] : memref<64x256xf32, #tpu.memory_space<vmem>>, vector<8x128xf32>
      %27 = arith.addf %24, %16 : vector<8x128xf32>
      %28 = vector.extract_strided_slice %27 {offsets = [0, 0], sizes = [8, 32], strides = [1, 1]} : vector<8x128xf32> to vector<8x32xf32>
      %29 = arith.negf %28 : vector<8x32xf32>
      %30 = math.exp %29 : vector<8x32xf32>
      %cst_16 = arith.constant 1.000000e+00 : f32
      %31 = vector.broadcast %cst_16 : f32 to vector<8x32xf32>
      %32 = arith.addf %31, %30 : vector<8x32xf32>
      %33 = arith.divf %31, %32 : vector<8x32xf32>
      %34 = vector.extract_strided_slice %27 {offsets = [0, 32], sizes = [8, 32], strides = [1, 1]} : vector<8x128xf32> to vector<8x32xf32>
      %35 = arith.negf %34 : vector<8x32xf32>
      %36 = math.exp %35 : vector<8x32xf32>
      %cst_17 = arith.constant 1.000000e+00 : f32
      %37 = vector.broadcast %cst_17 : f32 to vector<8x32xf32>
      %38 = arith.addf %37, %36 : vector<8x32xf32>
      %39 = arith.divf %37, %38 : vector<8x32xf32>
      %40 = vector.extract_strided_slice %27 {offsets = [0, 64], sizes = [8, 32], strides = [1, 1]} : vector<8x128xf32> to vector<8x32xf32>
      %41 = math.tanh %40 : vector<8x32xf32>
      %42 = vector.extract_strided_slice %27 {offsets = [0, 96], sizes = [8, 32], strides = [1, 1]} : vector<8x128xf32> to vector<8x32xf32>
      %43 = arith.negf %42 : vector<8x32xf32>
      %44 = math.exp %43 : vector<8x32xf32>
      %cst_18 = arith.constant 1.000000e+00 : f32
      %45 = vector.broadcast %cst_18 : f32 to vector<8x32xf32>
      %46 = arith.addf %45, %44 : vector<8x32xf32>
      %47 = arith.divf %45, %46 : vector<8x32xf32>
      %48 = arith.mulf %39, %15 : vector<8x32xf32>
      %49 = arith.mulf %33, %41 : vector<8x32xf32>
      %50 = arith.addf %48, %49 : vector<8x32xf32>
      %51 = math.tanh %50 : vector<8x32xf32>
      %52 = arith.mulf %47, %51 : vector<8x32xf32>
      %53 = arith.addf %26, %17 : vector<8x128xf32>
      %54 = vector.extract_strided_slice %53 {offsets = [0, 0], sizes = [8, 32], strides = [1, 1]} : vector<8x128xf32> to vector<8x32xf32>
      %55 = arith.negf %54 : vector<8x32xf32>
      %56 = math.exp %55 : vector<8x32xf32>
      %cst_19 = arith.constant 1.000000e+00 : f32
      %57 = vector.broadcast %cst_19 : f32 to vector<8x32xf32>
      %58 = arith.addf %57, %56 : vector<8x32xf32>
      %59 = arith.divf %57, %58 : vector<8x32xf32>
      %60 = vector.extract_strided_slice %53 {offsets = [0, 32], sizes = [8, 32], strides = [1, 1]} : vector<8x128xf32> to vector<8x32xf32>
      %61 = arith.negf %60 : vector<8x32xf32>
      %62 = math.exp %61 : vector<8x32xf32>
      %cst_20 = arith.constant 1.000000e+00 : f32
      %63 = vector.broadcast %cst_20 : f32 to vector<8x32xf32>
      %64 = arith.addf %63, %62 : vector<8x32xf32>
      %65 = arith.divf %63, %64 : vector<8x32xf32>
      %66 = vector.extract_strided_slice %53 {offsets = [0, 64], sizes = [8, 32], strides = [1, 1]} : vector<8x128xf32> to vector<8x32xf32>
      %67 = math.tanh %66 : vector<8x32xf32>
      %68 = vector.extract_strided_slice %53 {offsets = [0, 96], sizes = [8, 32], strides = [1, 1]} : vector<8x128xf32> to vector<8x32xf32>
      %69 = arith.negf %68 : vector<8x32xf32>
      %70 = math.exp %69 : vector<8x32xf32>
      %cst_21 = arith.constant 1.000000e+00 : f32
      %71 = vector.broadcast %cst_21 : f32 to vector<8x32xf32>
      %72 = arith.addf %71, %70 : vector<8x32xf32>
      %73 = arith.divf %71, %72 : vector<8x32xf32>
      %74 = arith.mulf %65, %15 : vector<8x32xf32>
      %75 = arith.mulf %59, %67 : vector<8x32xf32>
      %76 = arith.addf %74, %75 : vector<8x32xf32>
      %77 = math.tanh %76 : vector<8x32xf32>
      %78 = arith.mulf %73, %77 : vector<8x32xf32>
      %c1_i32_22 = arith.constant 1 : i32
      %cst_23 = arith.constant dense<0.000000e+00> : vector<8x128xf32>
      %79 = tpu.matmul %52, %13, %cst_23 {dimension_numbers = #tpu.dot_dimension_numbers<[1], [0], [0], [1], [0, 0, 1, 1], [], []>} : vector<8x32xf32>, vector<32x128xf32>, vector<8x128xf32> -> vector<8x128xf32>
      %cst_24 = arith.constant dense<0.000000e+00> : vector<8x128xf32>
      %80 = tpu.matmul %78, %14, %cst_24 {dimension_numbers = #tpu.dot_dimension_numbers<[1], [0], [0], [1], [0, 0, 1, 1], [], []>} : vector<8x32xf32>, vector<32x128xf32>, vector<8x128xf32> -> vector<8x128xf32>
      %c8_i32_25 = arith.constant 8 : i32
      %81 = arith.muli %c1_i32_22, %c8_i32_25 : i32
      %82 = tpu.assume_multiple %81, 8 : i32
      %c7_i32_26 = arith.constant 7 : i32
      %83 = arith.subi %c7_i32_26, %c1_i32_22 : i32
      %c8_i32_27 = arith.constant 8 : i32
      %84 = arith.muli %83, %c8_i32_27 : i32
      %85 = tpu.assume_multiple %84, 8 : i32
      %86 = arith.index_cast %82 : i32 to index
      %c0_28 = arith.constant 0 : index
      %87 = vector.load %arg10[%86, %c0_28] : memref<64x256xf32, #tpu.memory_space<vmem>>, vector<8x128xf32>
      %88 = arith.index_cast %85 : i32 to index
      %c128_29 = arith.constant 128 : index
      %89 = vector.load %arg10[%88, %c128_29] : memref<64x256xf32, #tpu.memory_space<vmem>>, vector<8x128xf32>
      %90 = arith.addf %87, %79 : vector<8x128xf32>
      %91 = vector.extract_strided_slice %90 {offsets = [0, 0], sizes = [8, 32], strides = [1, 1]} : vector<8x128xf32> to vector<8x32xf32>
      %92 = arith.negf %91 : vector<8x32xf32>
      %93 = math.exp %92 : vector<8x32xf32>
      %cst_30 = arith.constant 1.000000e+00 : f32
      %94 = vector.broadcast %cst_30 : f32 to vector<8x32xf32>
      %95 = arith.addf %94, %93 : vector<8x32xf32>
      %96 = arith.divf %94, %95 : vector<8x32xf32>
      %97 = vector.extract_strided_slice %90 {offsets = [0, 32], sizes = [8, 32], strides = [1, 1]} : vector<8x128xf32> to vector<8x32xf32>
      %98 = arith.negf %97 : vector<8x32xf32>
      %99 = math.exp %98 : vector<8x32xf32>
      %cst_31 = arith.constant 1.000000e+00 : f32
      %100 = vector.broadcast %cst_31 : f32 to vector<8x32xf32>
      %101 = arith.addf %100, %99 : vector<8x32xf32>
      %102 = arith.divf %100, %101 : vector<8x32xf32>
      %103 = vector.extract_strided_slice %90 {offsets = [0, 64], sizes = [8, 32], strides = [1, 1]} : vector<8x128xf32> to vector<8x32xf32>
      %104 = math.tanh %103 : vector<8x32xf32>
      %105 = vector.extract_strided_slice %90 {offsets = [0, 96], sizes = [8, 32], strides = [1, 1]} : vector<8x128xf32> to vector<8x32xf32>
      %106 = arith.negf %105 : vector<8x32xf32>
      %107 = math.exp %106 : vector<8x32xf32>
      %cst_32 = arith.constant 1.000000e+00 : f32
      %108 = vector.broadcast %cst_32 : f32 to vector<8x32xf32>
      %109 = arith.addf %108, %107 : vector<8x32xf32>
      %110 = arith.divf %108, %109 : vector<8x32xf32>
      %111 = arith.mulf %102, %50 : vector<8x32xf32>
      %112 = arith.mulf %96, %104 : vector<8x32xf32>
      %113 = arith.addf %111, %112 : vector<8x32xf32>
      %114 = math.tanh %113 : vector<8x32xf32>
      %115 = arith.mulf %110, %114 : vector<8x32xf32>
      %116 = arith.addf %89, %80 : vector<8x128xf32>
      %117 = vector.extract_strided_slice %116 {offsets = [0, 0], sizes = [8, 32], strides = [1, 1]} : vector<8x128xf32> to vector<8x32xf32>
      %118 = arith.negf %117 : vector<8x32xf32>
      %119 = math.exp %118 : vector<8x32xf32>
      %cst_33 = arith.constant 1.000000e+00 : f32
      %120 = vector.broadcast %cst_33 : f32 to vector<8x32xf32>
      %121 = arith.addf %120, %119 : vector<8x32xf32>
      %122 = arith.divf %120, %121 : vector<8x32xf32>
      %123 = vector.extract_strided_slice %116 {offsets = [0, 32], sizes = [8, 32], strides = [1, 1]} : vector<8x128xf32> to vector<8x32xf32>
      %124 = arith.negf %123 : vector<8x32xf32>
      %125 = math.exp %124 : vector<8x32xf32>
      %cst_34 = arith.constant 1.000000e+00 : f32
      %126 = vector.broadcast %cst_34 : f32 to vector<8x32xf32>
      %127 = arith.addf %126, %125 : vector<8x32xf32>
      %128 = arith.divf %126, %127 : vector<8x32xf32>
      %129 = vector.extract_strided_slice %116 {offsets = [0, 64], sizes = [8, 32], strides = [1, 1]} : vector<8x128xf32> to vector<8x32xf32>
      %130 = math.tanh %129 : vector<8x32xf32>
      %131 = vector.extract_strided_slice %116 {offsets = [0, 96], sizes = [8, 32], strides = [1, 1]} : vector<8x128xf32> to vector<8x32xf32>
      %132 = arith.negf %131 : vector<8x32xf32>
      %133 = math.exp %132 : vector<8x32xf32>
      %cst_35 = arith.constant 1.000000e+00 : f32
      %134 = vector.broadcast %cst_35 : f32 to vector<8x32xf32>
      %135 = arith.addf %134, %133 : vector<8x32xf32>
      %136 = arith.divf %134, %135 : vector<8x32xf32>
      %137 = arith.mulf %128, %76 : vector<8x32xf32>
      %138 = arith.mulf %122, %130 : vector<8x32xf32>
      %139 = arith.addf %137, %138 : vector<8x32xf32>
      %140 = math.tanh %139 : vector<8x32xf32>
      %141 = arith.mulf %136, %140 : vector<8x32xf32>
      %c2_i32 = arith.constant 2 : i32
      %cst_36 = arith.constant dense<0.000000e+00> : vector<8x128xf32>
      %142 = tpu.matmul %115, %13, %cst_36 {dimension_numbers = #tpu.dot_dimension_numbers<[1], [0], [0], [1], [0, 0, 1, 1], [], []>} : vector<8x32xf32>, vector<32x128xf32>, vector<8x128xf32> -> vector<8x128xf32>
      %cst_37 = arith.constant dense<0.000000e+00> : vector<8x128xf32>
      %143 = tpu.matmul %141, %14, %cst_37 {dimension_numbers = #tpu.dot_dimension_numbers<[1], [0], [0], [1], [0, 0, 1, 1], [], []>} : vector<8x32xf32>, vector<32x128xf32>, vector<8x128xf32> -> vector<8x128xf32>
      %c8_i32_38 = arith.constant 8 : i32
      %144 = arith.muli %c2_i32, %c8_i32_38 : i32
      %145 = tpu.assume_multiple %144, 8 : i32
      %c7_i32_39 = arith.constant 7 : i32
      %146 = arith.subi %c7_i32_39, %c2_i32 : i32
      %c8_i32_40 = arith.constant 8 : i32
      %147 = arith.muli %146, %c8_i32_40 : i32
      %148 = tpu.assume_multiple %147, 8 : i32
      %149 = arith.index_cast %145 : i32 to index
      %c0_41 = arith.constant 0 : index
      %150 = vector.load %arg10[%149, %c0_41] : memref<64x256xf32, #tpu.memory_space<vmem>>, vector<8x128xf32>
      %151 = arith.index_cast %148 : i32 to index
      %c128_42 = arith.constant 128 : index
      %152 = vector.load %arg10[%151, %c128_42] : memref<64x256xf32, #tpu.memory_space<vmem>>, vector<8x128xf32>
      %153 = arith.addf %150, %142 : vector<8x128xf32>
      %154 = vector.extract_strided_slice %153 {offsets = [0, 0], sizes = [8, 32], strides = [1, 1]} : vector<8x128xf32> to vector<8x32xf32>
      %155 = arith.negf %154 : vector<8x32xf32>
      %156 = math.exp %155 : vector<8x32xf32>
      %cst_43 = arith.constant 1.000000e+00 : f32
      %157 = vector.broadcast %cst_43 : f32 to vector<8x32xf32>
      %158 = arith.addf %157, %156 : vector<8x32xf32>
      %159 = arith.divf %157, %158 : vector<8x32xf32>
      %160 = vector.extract_strided_slice %153 {offsets = [0, 32], sizes = [8, 32], strides = [1, 1]} : vector<8x128xf32> to vector<8x32xf32>
      %161 = arith.negf %160 : vector<8x32xf32>
      %162 = math.exp %161 : vector<8x32xf32>
      %cst_44 = arith.constant 1.000000e+00 : f32
      %163 = vector.broadcast %cst_44 : f32 to vector<8x32xf32>
      %164 = arith.addf %163, %162 : vector<8x32xf32>
      %165 = arith.divf %163, %164 : vector<8x32xf32>
      %166 = vector.extract_strided_slice %153 {offsets = [0, 64], sizes = [8, 32], strides = [1, 1]} : vector<8x128xf32> to vector<8x32xf32>
      %167 = math.tanh %166 : vector<8x32xf32>
      %168 = vector.extract_strided_slice %153 {offsets = [0, 96], sizes = [8, 32], strides = [1, 1]} : vector<8x128xf32> to vector<8x32xf32>
      %169 = arith.negf %168 : vector<8x32xf32>
      %170 = math.exp %169 : vector<8x32xf32>
      %cst_45 = arith.constant 1.000000e+00 : f32
      %171 = vector.broadcast %cst_45 : f32 to vector<8x32xf32>
      %172 = arith.addf %171, %170 : vector<8x32xf32>
      %173 = arith.divf %171, %172 : vector<8x32xf32>
      %174 = arith.mulf %165, %113 : vector<8x32xf32>
      %175 = arith.mulf %159, %167 : vector<8x32xf32>
      %176 = arith.addf %174, %175 : vector<8x32xf32>
      %177 = math.tanh %176 : vector<8x32xf32>
      %178 = arith.mulf %173, %177 : vector<8x32xf32>
      %179 = arith.addf %152, %143 : vector<8x128xf32>
      %180 = vector.extract_strided_slice %179 {offsets = [0, 0], sizes = [8, 32], strides = [1, 1]} : vector<8x128xf32> to vector<8x32xf32>
      %181 = arith.negf %180 : vector<8x32xf32>
      %182 = math.exp %181 : vector<8x32xf32>
      %cst_46 = arith.constant 1.000000e+00 : f32
      %183 = vector.broadcast %cst_46 : f32 to vector<8x32xf32>
      %184 = arith.addf %183, %182 : vector<8x32xf32>
      %185 = arith.divf %183, %184 : vector<8x32xf32>
      %186 = vector.extract_strided_slice %179 {offsets = [0, 32], sizes = [8, 32], strides = [1, 1]} : vector<8x128xf32> to vector<8x32xf32>
      %187 = arith.negf %186 : vector<8x32xf32>
      %188 = math.exp %187 : vector<8x32xf32>
      %cst_47 = arith.constant 1.000000e+00 : f32
      %189 = vector.broadcast %cst_47 : f32 to vector<8x32xf32>
      %190 = arith.addf %189, %188 : vector<8x32xf32>
      %191 = arith.divf %189, %190 : vector<8x32xf32>
      %192 = vector.extract_strided_slice %179 {offsets = [0, 64], sizes = [8, 32], strides = [1, 1]} : vector<8x128xf32> to vector<8x32xf32>
      %193 = math.tanh %192 : vector<8x32xf32>
      %194 = vector.extract_strided_slice %179 {offsets = [0, 96], sizes = [8, 32], strides = [1, 1]} : vector<8x128xf32> to vector<8x32xf32>
      %195 = arith.negf %194 : vector<8x32xf32>
      %196 = math.exp %195 : vector<8x32xf32>
      %cst_48 = arith.constant 1.000000e+00 : f32
      %197 = vector.broadcast %cst_48 : f32 to vector<8x32xf32>
      %198 = arith.addf %197, %196 : vector<8x32xf32>
      %199 = arith.divf %197, %198 : vector<8x32xf32>
      %200 = arith.mulf %191, %139 : vector<8x32xf32>
      %201 = arith.mulf %185, %193 : vector<8x32xf32>
      %202 = arith.addf %200, %201 : vector<8x32xf32>
      %203 = math.tanh %202 : vector<8x32xf32>
      %204 = arith.mulf %199, %203 : vector<8x32xf32>
      %c3_i32 = arith.constant 3 : i32
      %cst_49 = arith.constant dense<0.000000e+00> : vector<8x128xf32>
      %205 = tpu.matmul %178, %13, %cst_49 {dimension_numbers = #tpu.dot_dimension_numbers<[1], [0], [0], [1], [0, 0, 1, 1], [], []>} : vector<8x32xf32>, vector<32x128xf32>, vector<8x128xf32> -> vector<8x128xf32>
      %cst_50 = arith.constant dense<0.000000e+00> : vector<8x128xf32>
      %206 = tpu.matmul %204, %14, %cst_50 {dimension_numbers = #tpu.dot_dimension_numbers<[1], [0], [0], [1], [0, 0, 1, 1], [], []>} : vector<8x32xf32>, vector<32x128xf32>, vector<8x128xf32> -> vector<8x128xf32>
      %c8_i32_51 = arith.constant 8 : i32
      %207 = arith.muli %c3_i32, %c8_i32_51 : i32
      %208 = tpu.assume_multiple %207, 8 : i32
      %c7_i32_52 = arith.constant 7 : i32
      %209 = arith.subi %c7_i32_52, %c3_i32 : i32
      %c8_i32_53 = arith.constant 8 : i32
      %210 = arith.muli %209, %c8_i32_53 : i32
      %211 = tpu.assume_multiple %210, 8 : i32
      %212 = arith.index_cast %208 : i32 to index
      %c0_54 = arith.constant 0 : index
      %213 = vector.load %arg10[%212, %c0_54] : memref<64x256xf32, #tpu.memory_space<vmem>>, vector<8x128xf32>
      %214 = arith.index_cast %211 : i32 to index
      %c128_55 = arith.constant 128 : index
      %215 = vector.load %arg10[%214, %c128_55] : memref<64x256xf32, #tpu.memory_space<vmem>>, vector<8x128xf32>
      %216 = arith.addf %213, %205 : vector<8x128xf32>
      %217 = vector.extract_strided_slice %216 {offsets = [0, 0], sizes = [8, 32], strides = [1, 1]} : vector<8x128xf32> to vector<8x32xf32>
      %218 = arith.negf %217 : vector<8x32xf32>
      %219 = math.exp %218 : vector<8x32xf32>
      %cst_56 = arith.constant 1.000000e+00 : f32
      %220 = vector.broadcast %cst_56 : f32 to vector<8x32xf32>
      %221 = arith.addf %220, %219 : vector<8x32xf32>
      %222 = arith.divf %220, %221 : vector<8x32xf32>
      %223 = vector.extract_strided_slice %216 {offsets = [0, 32], sizes = [8, 32], strides = [1, 1]} : vector<8x128xf32> to vector<8x32xf32>
      %224 = arith.negf %223 : vector<8x32xf32>
      %225 = math.exp %224 : vector<8x32xf32>
      %cst_57 = arith.constant 1.000000e+00 : f32
      %226 = vector.broadcast %cst_57 : f32 to vector<8x32xf32>
      %227 = arith.addf %226, %225 : vector<8x32xf32>
      %228 = arith.divf %226, %227 : vector<8x32xf32>
      %229 = vector.extract_strided_slice %216 {offsets = [0, 64], sizes = [8, 32], strides = [1, 1]} : vector<8x128xf32> to vector<8x32xf32>
      %230 = math.tanh %229 : vector<8x32xf32>
      %231 = vector.extract_strided_slice %216 {offsets = [0, 96], sizes = [8, 32], strides = [1, 1]} : vector<8x128xf32> to vector<8x32xf32>
      %232 = arith.negf %231 : vector<8x32xf32>
      %233 = math.exp %232 : vector<8x32xf32>
      %cst_58 = arith.constant 1.000000e+00 : f32
      %234 = vector.broadcast %cst_58 : f32 to vector<8x32xf32>
      %235 = arith.addf %234, %233 : vector<8x32xf32>
      %236 = arith.divf %234, %235 : vector<8x32xf32>
      %237 = arith.mulf %228, %176 : vector<8x32xf32>
      %238 = arith.mulf %222, %230 : vector<8x32xf32>
      %239 = arith.addf %237, %238 : vector<8x32xf32>
      %240 = math.tanh %239 : vector<8x32xf32>
      %241 = arith.mulf %236, %240 : vector<8x32xf32>
      %242 = arith.addf %215, %206 : vector<8x128xf32>
      %243 = vector.extract_strided_slice %242 {offsets = [0, 0], sizes = [8, 32], strides = [1, 1]} : vector<8x128xf32> to vector<8x32xf32>
      %244 = arith.negf %243 : vector<8x32xf32>
      %245 = math.exp %244 : vector<8x32xf32>
      %cst_59 = arith.constant 1.000000e+00 : f32
      %246 = vector.broadcast %cst_59 : f32 to vector<8x32xf32>
      %247 = arith.addf %246, %245 : vector<8x32xf32>
      %248 = arith.divf %246, %247 : vector<8x32xf32>
      %249 = vector.extract_strided_slice %242 {offsets = [0, 32], sizes = [8, 32], strides = [1, 1]} : vector<8x128xf32> to vector<8x32xf32>
      %250 = arith.negf %249 : vector<8x32xf32>
      %251 = math.exp %250 : vector<8x32xf32>
      %cst_60 = arith.constant 1.000000e+00 : f32
      %252 = vector.broadcast %cst_60 : f32 to vector<8x32xf32>
      %253 = arith.addf %252, %251 : vector<8x32xf32>
      %254 = arith.divf %252, %253 : vector<8x32xf32>
      %255 = vector.extract_strided_slice %242 {offsets = [0, 64], sizes = [8, 32], strides = [1, 1]} : vector<8x128xf32> to vector<8x32xf32>
      %256 = math.tanh %255 : vector<8x32xf32>
      %257 = vector.extract_strided_slice %242 {offsets = [0, 96], sizes = [8, 32], strides = [1, 1]} : vector<8x128xf32> to vector<8x32xf32>
      %258 = arith.negf %257 : vector<8x32xf32>
      %259 = math.exp %258 : vector<8x32xf32>
      %cst_61 = arith.constant 1.000000e+00 : f32
      %260 = vector.broadcast %cst_61 : f32 to vector<8x32xf32>
      %261 = arith.addf %260, %259 : vector<8x32xf32>
      %262 = arith.divf %260, %261 : vector<8x32xf32>
      %263 = arith.mulf %254, %202 : vector<8x32xf32>
      %264 = arith.mulf %248, %256 : vector<8x32xf32>
      %265 = arith.addf %263, %264 : vector<8x32xf32>
      %266 = math.tanh %265 : vector<8x32xf32>
      %267 = arith.mulf %262, %266 : vector<8x32xf32>
      %c4_i32 = arith.constant 4 : i32
      %cst_62 = arith.constant dense<0.000000e+00> : vector<8x128xf32>
      %268 = tpu.matmul %241, %13, %cst_62 {dimension_numbers = #tpu.dot_dimension_numbers<[1], [0], [0], [1], [0, 0, 1, 1], [], []>} : vector<8x32xf32>, vector<32x128xf32>, vector<8x128xf32> -> vector<8x128xf32>
      %cst_63 = arith.constant dense<0.000000e+00> : vector<8x128xf32>
      %269 = tpu.matmul %267, %14, %cst_63 {dimension_numbers = #tpu.dot_dimension_numbers<[1], [0], [0], [1], [0, 0, 1, 1], [], []>} : vector<8x32xf32>, vector<32x128xf32>, vector<8x128xf32> -> vector<8x128xf32>
      %c8_i32_64 = arith.constant 8 : i32
      %270 = arith.muli %c4_i32, %c8_i32_64 : i32
      %271 = tpu.assume_multiple %270, 8 : i32
      %c7_i32_65 = arith.constant 7 : i32
      %272 = arith.subi %c7_i32_65, %c4_i32 : i32
      %c8_i32_66 = arith.constant 8 : i32
      %273 = arith.muli %272, %c8_i32_66 : i32
      %274 = tpu.assume_multiple %273, 8 : i32
      %275 = arith.index_cast %271 : i32 to index
      %c0_67 = arith.constant 0 : index
      %276 = vector.load %arg10[%275, %c0_67] : memref<64x256xf32, #tpu.memory_space<vmem>>, vector<8x128xf32>
      %277 = arith.index_cast %274 : i32 to index
      %c128_68 = arith.constant 128 : index
      %278 = vector.load %arg10[%277, %c128_68] : memref<64x256xf32, #tpu.memory_space<vmem>>, vector<8x128xf32>
      %279 = arith.addf %276, %268 : vector<8x128xf32>
      %280 = vector.extract_strided_slice %279 {offsets = [0, 0], sizes = [8, 32], strides = [1, 1]} : vector<8x128xf32> to vector<8x32xf32>
      %281 = arith.negf %280 : vector<8x32xf32>
      %282 = math.exp %281 : vector<8x32xf32>
      %cst_69 = arith.constant 1.000000e+00 : f32
      %283 = vector.broadcast %cst_69 : f32 to vector<8x32xf32>
      %284 = arith.addf %283, %282 : vector<8x32xf32>
      %285 = arith.divf %283, %284 : vector<8x32xf32>
      %286 = vector.extract_strided_slice %279 {offsets = [0, 32], sizes = [8, 32], strides = [1, 1]} : vector<8x128xf32> to vector<8x32xf32>
      %287 = arith.negf %286 : vector<8x32xf32>
      %288 = math.exp %287 : vector<8x32xf32>
      %cst_70 = arith.constant 1.000000e+00 : f32
      %289 = vector.broadcast %cst_70 : f32 to vector<8x32xf32>
      %290 = arith.addf %289, %288 : vector<8x32xf32>
      %291 = arith.divf %289, %290 : vector<8x32xf32>
      %292 = vector.extract_strided_slice %279 {offsets = [0, 64], sizes = [8, 32], strides = [1, 1]} : vector<8x128xf32> to vector<8x32xf32>
      %293 = math.tanh %292 : vector<8x32xf32>
      %294 = vector.extract_strided_slice %279 {offsets = [0, 96], sizes = [8, 32], strides = [1, 1]} : vector<8x128xf32> to vector<8x32xf32>
      %295 = arith.negf %294 : vector<8x32xf32>
      %296 = math.exp %295 : vector<8x32xf32>
      %cst_71 = arith.constant 1.000000e+00 : f32
      %297 = vector.broadcast %cst_71 : f32 to vector<8x32xf32>
      %298 = arith.addf %297, %296 : vector<8x32xf32>
      %299 = arith.divf %297, %298 : vector<8x32xf32>
      %300 = arith.mulf %291, %239 : vector<8x32xf32>
      %301 = arith.mulf %285, %293 : vector<8x32xf32>
      %302 = arith.addf %300, %301 : vector<8x32xf32>
      %303 = math.tanh %302 : vector<8x32xf32>
      %304 = arith.mulf %299, %303 : vector<8x32xf32>
      %305 = arith.addf %278, %269 : vector<8x128xf32>
      %306 = vector.extract_strided_slice %305 {offsets = [0, 0], sizes = [8, 32], strides = [1, 1]} : vector<8x128xf32> to vector<8x32xf32>
      %307 = arith.negf %306 : vector<8x32xf32>
      %308 = math.exp %307 : vector<8x32xf32>
      %cst_72 = arith.constant 1.000000e+00 : f32
      %309 = vector.broadcast %cst_72 : f32 to vector<8x32xf32>
      %310 = arith.addf %309, %308 : vector<8x32xf32>
      %311 = arith.divf %309, %310 : vector<8x32xf32>
      %312 = vector.extract_strided_slice %305 {offsets = [0, 32], sizes = [8, 32], strides = [1, 1]} : vector<8x128xf32> to vector<8x32xf32>
      %313 = arith.negf %312 : vector<8x32xf32>
      %314 = math.exp %313 : vector<8x32xf32>
      %cst_73 = arith.constant 1.000000e+00 : f32
      %315 = vector.broadcast %cst_73 : f32 to vector<8x32xf32>
      %316 = arith.addf %315, %314 : vector<8x32xf32>
      %317 = arith.divf %315, %316 : vector<8x32xf32>
      %318 = vector.extract_strided_slice %305 {offsets = [0, 64], sizes = [8, 32], strides = [1, 1]} : vector<8x128xf32> to vector<8x32xf32>
      %319 = math.tanh %318 : vector<8x32xf32>
      %320 = vector.extract_strided_slice %305 {offsets = [0, 96], sizes = [8, 32], strides = [1, 1]} : vector<8x128xf32> to vector<8x32xf32>
      %321 = arith.negf %320 : vector<8x32xf32>
      %322 = math.exp %321 : vector<8x32xf32>
      %cst_74 = arith.constant 1.000000e+00 : f32
      %323 = vector.broadcast %cst_74 : f32 to vector<8x32xf32>
      %324 = arith.addf %323, %322 : vector<8x32xf32>
      %325 = arith.divf %323, %324 : vector<8x32xf32>
      %326 = arith.mulf %317, %265 : vector<8x32xf32>
      %327 = arith.mulf %311, %319 : vector<8x32xf32>
      %328 = arith.addf %326, %327 : vector<8x32xf32>
      %329 = math.tanh %328 : vector<8x32xf32>
      %330 = arith.mulf %325, %329 : vector<8x32xf32>
      %c5_i32 = arith.constant 5 : i32
      %cst_75 = arith.constant dense<0.000000e+00> : vector<8x128xf32>
      %331 = tpu.matmul %304, %13, %cst_75 {dimension_numbers = #tpu.dot_dimension_numbers<[1], [0], [0], [1], [0, 0, 1, 1], [], []>} : vector<8x32xf32>, vector<32x128xf32>, vector<8x128xf32> -> vector<8x128xf32>
      %cst_76 = arith.constant dense<0.000000e+00> : vector<8x128xf32>
      %332 = tpu.matmul %330, %14, %cst_76 {dimension_numbers = #tpu.dot_dimension_numbers<[1], [0], [0], [1], [0, 0, 1, 1], [], []>} : vector<8x32xf32>, vector<32x128xf32>, vector<8x128xf32> -> vector<8x128xf32>
      %c8_i32_77 = arith.constant 8 : i32
      %333 = arith.muli %c5_i32, %c8_i32_77 : i32
      %334 = tpu.assume_multiple %333, 8 : i32
      %c7_i32_78 = arith.constant 7 : i32
      %335 = arith.subi %c7_i32_78, %c5_i32 : i32
      %c8_i32_79 = arith.constant 8 : i32
      %336 = arith.muli %335, %c8_i32_79 : i32
      %337 = tpu.assume_multiple %336, 8 : i32
      %338 = arith.index_cast %334 : i32 to index
      %c0_80 = arith.constant 0 : index
      %339 = vector.load %arg10[%338, %c0_80] : memref<64x256xf32, #tpu.memory_space<vmem>>, vector<8x128xf32>
      %340 = arith.index_cast %337 : i32 to index
      %c128_81 = arith.constant 128 : index
      %341 = vector.load %arg10[%340, %c128_81] : memref<64x256xf32, #tpu.memory_space<vmem>>, vector<8x128xf32>
      %342 = arith.addf %339, %331 : vector<8x128xf32>
      %343 = vector.extract_strided_slice %342 {offsets = [0, 0], sizes = [8, 32], strides = [1, 1]} : vector<8x128xf32> to vector<8x32xf32>
      %344 = arith.negf %343 : vector<8x32xf32>
      %345 = math.exp %344 : vector<8x32xf32>
      %cst_82 = arith.constant 1.000000e+00 : f32
      %346 = vector.broadcast %cst_82 : f32 to vector<8x32xf32>
      %347 = arith.addf %346, %345 : vector<8x32xf32>
      %348 = arith.divf %346, %347 : vector<8x32xf32>
      %349 = vector.extract_strided_slice %342 {offsets = [0, 32], sizes = [8, 32], strides = [1, 1]} : vector<8x128xf32> to vector<8x32xf32>
      %350 = arith.negf %349 : vector<8x32xf32>
      %351 = math.exp %350 : vector<8x32xf32>
      %cst_83 = arith.constant 1.000000e+00 : f32
      %352 = vector.broadcast %cst_83 : f32 to vector<8x32xf32>
      %353 = arith.addf %352, %351 : vector<8x32xf32>
      %354 = arith.divf %352, %353 : vector<8x32xf32>
      %355 = vector.extract_strided_slice %342 {offsets = [0, 64], sizes = [8, 32], strides = [1, 1]} : vector<8x128xf32> to vector<8x32xf32>
      %356 = math.tanh %355 : vector<8x32xf32>
      %357 = vector.extract_strided_slice %342 {offsets = [0, 96], sizes = [8, 32], strides = [1, 1]} : vector<8x128xf32> to vector<8x32xf32>
      %358 = arith.negf %357 : vector<8x32xf32>
      %359 = math.exp %358 : vector<8x32xf32>
      %cst_84 = arith.constant 1.000000e+00 : f32
      %360 = vector.broadcast %cst_84 : f32 to vector<8x32xf32>
      %361 = arith.addf %360, %359 : vector<8x32xf32>
      %362 = arith.divf %360, %361 : vector<8x32xf32>
      %363 = arith.mulf %354, %302 : vector<8x32xf32>
      %364 = arith.mulf %348, %356 : vector<8x32xf32>
      %365 = arith.addf %363, %364 : vector<8x32xf32>
      %366 = math.tanh %365 : vector<8x32xf32>
      %367 = arith.mulf %362, %366 : vector<8x32xf32>
      %368 = arith.addf %341, %332 : vector<8x128xf32>
      %369 = vector.extract_strided_slice %368 {offsets = [0, 0], sizes = [8, 32], strides = [1, 1]} : vector<8x128xf32> to vector<8x32xf32>
      %370 = arith.negf %369 : vector<8x32xf32>
      %371 = math.exp %370 : vector<8x32xf32>
      %cst_85 = arith.constant 1.000000e+00 : f32
      %372 = vector.broadcast %cst_85 : f32 to vector<8x32xf32>
      %373 = arith.addf %372, %371 : vector<8x32xf32>
      %374 = arith.divf %372, %373 : vector<8x32xf32>
      %375 = vector.extract_strided_slice %368 {offsets = [0, 32], sizes = [8, 32], strides = [1, 1]} : vector<8x128xf32> to vector<8x32xf32>
      %376 = arith.negf %375 : vector<8x32xf32>
      %377 = math.exp %376 : vector<8x32xf32>
      %cst_86 = arith.constant 1.000000e+00 : f32
      %378 = vector.broadcast %cst_86 : f32 to vector<8x32xf32>
      %379 = arith.addf %378, %377 : vector<8x32xf32>
      %380 = arith.divf %378, %379 : vector<8x32xf32>
      %381 = vector.extract_strided_slice %368 {offsets = [0, 64], sizes = [8, 32], strides = [1, 1]} : vector<8x128xf32> to vector<8x32xf32>
      %382 = math.tanh %381 : vector<8x32xf32>
      %383 = vector.extract_strided_slice %368 {offsets = [0, 96], sizes = [8, 32], strides = [1, 1]} : vector<8x128xf32> to vector<8x32xf32>
      %384 = arith.negf %383 : vector<8x32xf32>
      %385 = math.exp %384 : vector<8x32xf32>
      %cst_87 = arith.constant 1.000000e+00 : f32
      %386 = vector.broadcast %cst_87 : f32 to vector<8x32xf32>
      %387 = arith.addf %386, %385 : vector<8x32xf32>
      %388 = arith.divf %386, %387 : vector<8x32xf32>
      %389 = arith.mulf %380, %328 : vector<8x32xf32>
      %390 = arith.mulf %374, %382 : vector<8x32xf32>
      %391 = arith.addf %389, %390 : vector<8x32xf32>
      %392 = math.tanh %391 : vector<8x32xf32>
      %393 = arith.mulf %388, %392 : vector<8x32xf32>
      %c6_i32 = arith.constant 6 : i32
      %cst_88 = arith.constant dense<0.000000e+00> : vector<8x128xf32>
      %394 = tpu.matmul %367, %13, %cst_88 {dimension_numbers = #tpu.dot_dimension_numbers<[1], [0], [0], [1], [0, 0, 1, 1], [], []>} : vector<8x32xf32>, vector<32x128xf32>, vector<8x128xf32> -> vector<8x128xf32>
      %cst_89 = arith.constant dense<0.000000e+00> : vector<8x128xf32>
      %395 = tpu.matmul %393, %14, %cst_89 {dimension_numbers = #tpu.dot_dimension_numbers<[1], [0], [0], [1], [0, 0, 1, 1], [], []>} : vector<8x32xf32>, vector<32x128xf32>, vector<8x128xf32> -> vector<8x128xf32>
      %c8_i32_90 = arith.constant 8 : i32
      %396 = arith.muli %c6_i32, %c8_i32_90 : i32
      %397 = tpu.assume_multiple %396, 8 : i32
      %c7_i32_91 = arith.constant 7 : i32
      %398 = arith.subi %c7_i32_91, %c6_i32 : i32
      %c8_i32_92 = arith.constant 8 : i32
      %399 = arith.muli %398, %c8_i32_92 : i32
      %400 = tpu.assume_multiple %399, 8 : i32
      %401 = arith.index_cast %397 : i32 to index
      %c0_93 = arith.constant 0 : index
      %402 = vector.load %arg10[%401, %c0_93] : memref<64x256xf32, #tpu.memory_space<vmem>>, vector<8x128xf32>
      %403 = arith.index_cast %400 : i32 to index
      %c128_94 = arith.constant 128 : index
      %404 = vector.load %arg10[%403, %c128_94] : memref<64x256xf32, #tpu.memory_space<vmem>>, vector<8x128xf32>
      %405 = arith.addf %402, %394 : vector<8x128xf32>
      %406 = vector.extract_strided_slice %405 {offsets = [0, 0], sizes = [8, 32], strides = [1, 1]} : vector<8x128xf32> to vector<8x32xf32>
      %407 = arith.negf %406 : vector<8x32xf32>
      %408 = math.exp %407 : vector<8x32xf32>
      %cst_95 = arith.constant 1.000000e+00 : f32
      %409 = vector.broadcast %cst_95 : f32 to vector<8x32xf32>
      %410 = arith.addf %409, %408 : vector<8x32xf32>
      %411 = arith.divf %409, %410 : vector<8x32xf32>
      %412 = vector.extract_strided_slice %405 {offsets = [0, 32], sizes = [8, 32], strides = [1, 1]} : vector<8x128xf32> to vector<8x32xf32>
      %413 = arith.negf %412 : vector<8x32xf32>
      %414 = math.exp %413 : vector<8x32xf32>
      %cst_96 = arith.constant 1.000000e+00 : f32
      %415 = vector.broadcast %cst_96 : f32 to vector<8x32xf32>
      %416 = arith.addf %415, %414 : vector<8x32xf32>
      %417 = arith.divf %415, %416 : vector<8x32xf32>
      %418 = vector.extract_strided_slice %405 {offsets = [0, 64], sizes = [8, 32], strides = [1, 1]} : vector<8x128xf32> to vector<8x32xf32>
      %419 = math.tanh %418 : vector<8x32xf32>
      %420 = vector.extract_strided_slice %405 {offsets = [0, 96], sizes = [8, 32], strides = [1, 1]} : vector<8x128xf32> to vector<8x32xf32>
      %421 = arith.negf %420 : vector<8x32xf32>
      %422 = math.exp %421 : vector<8x32xf32>
      %cst_97 = arith.constant 1.000000e+00 : f32
      %423 = vector.broadcast %cst_97 : f32 to vector<8x32xf32>
      %424 = arith.addf %423, %422 : vector<8x32xf32>
      %425 = arith.divf %423, %424 : vector<8x32xf32>
      %426 = arith.mulf %417, %365 : vector<8x32xf32>
      %427 = arith.mulf %411, %419 : vector<8x32xf32>
      %428 = arith.addf %426, %427 : vector<8x32xf32>
      %429 = math.tanh %428 : vector<8x32xf32>
      %430 = arith.mulf %425, %429 : vector<8x32xf32>
      %431 = arith.addf %404, %395 : vector<8x128xf32>
      %432 = vector.extract_strided_slice %431 {offsets = [0, 0], sizes = [8, 32], strides = [1, 1]} : vector<8x128xf32> to vector<8x32xf32>
      %433 = arith.negf %432 : vector<8x32xf32>
      %434 = math.exp %433 : vector<8x32xf32>
      %cst_98 = arith.constant 1.000000e+00 : f32
      %435 = vector.broadcast %cst_98 : f32 to vector<8x32xf32>
      %436 = arith.addf %435, %434 : vector<8x32xf32>
      %437 = arith.divf %435, %436 : vector<8x32xf32>
      %438 = vector.extract_strided_slice %431 {offsets = [0, 32], sizes = [8, 32], strides = [1, 1]} : vector<8x128xf32> to vector<8x32xf32>
      %439 = arith.negf %438 : vector<8x32xf32>
      %440 = math.exp %439 : vector<8x32xf32>
      %cst_99 = arith.constant 1.000000e+00 : f32
      %441 = vector.broadcast %cst_99 : f32 to vector<8x32xf32>
      %442 = arith.addf %441, %440 : vector<8x32xf32>
      %443 = arith.divf %441, %442 : vector<8x32xf32>
      %444 = vector.extract_strided_slice %431 {offsets = [0, 64], sizes = [8, 32], strides = [1, 1]} : vector<8x128xf32> to vector<8x32xf32>
      %445 = math.tanh %444 : vector<8x32xf32>
      %446 = vector.extract_strided_slice %431 {offsets = [0, 96], sizes = [8, 32], strides = [1, 1]} : vector<8x128xf32> to vector<8x32xf32>
      %447 = arith.negf %446 : vector<8x32xf32>
      %448 = math.exp %447 : vector<8x32xf32>
      %cst_100 = arith.constant 1.000000e+00 : f32
      %449 = vector.broadcast %cst_100 : f32 to vector<8x32xf32>
      %450 = arith.addf %449, %448 : vector<8x32xf32>
      %451 = arith.divf %449, %450 : vector<8x32xf32>
      %452 = arith.mulf %443, %391 : vector<8x32xf32>
      %453 = arith.mulf %437, %445 : vector<8x32xf32>
      %454 = arith.addf %452, %453 : vector<8x32xf32>
      %455 = math.tanh %454 : vector<8x32xf32>
      %456 = arith.mulf %451, %455 : vector<8x32xf32>
      %c7_i32_101 = arith.constant 7 : i32
      %cst_102 = arith.constant dense<0.000000e+00> : vector<8x128xf32>
      %457 = tpu.matmul %430, %13, %cst_102 {dimension_numbers = #tpu.dot_dimension_numbers<[1], [0], [0], [1], [0, 0, 1, 1], [], []>} : vector<8x32xf32>, vector<32x128xf32>, vector<8x128xf32> -> vector<8x128xf32>
      %cst_103 = arith.constant dense<0.000000e+00> : vector<8x128xf32>
      %458 = tpu.matmul %456, %14, %cst_103 {dimension_numbers = #tpu.dot_dimension_numbers<[1], [0], [0], [1], [0, 0, 1, 1], [], []>} : vector<8x32xf32>, vector<32x128xf32>, vector<8x128xf32> -> vector<8x128xf32>
      %c8_i32_104 = arith.constant 8 : i32
      %459 = arith.muli %c7_i32_101, %c8_i32_104 : i32
      %460 = tpu.assume_multiple %459, 8 : i32
      %c7_i32_105 = arith.constant 7 : i32
      %461 = arith.subi %c7_i32_105, %c7_i32_101 : i32
      %c8_i32_106 = arith.constant 8 : i32
      %462 = arith.muli %461, %c8_i32_106 : i32
      %463 = tpu.assume_multiple %462, 8 : i32
      %464 = arith.index_cast %460 : i32 to index
      %c0_107 = arith.constant 0 : index
      %465 = vector.load %arg10[%464, %c0_107] : memref<64x256xf32, #tpu.memory_space<vmem>>, vector<8x128xf32>
      %466 = arith.index_cast %463 : i32 to index
      %c128_108 = arith.constant 128 : index
      %467 = vector.load %arg10[%466, %c128_108] : memref<64x256xf32, #tpu.memory_space<vmem>>, vector<8x128xf32>
      %468 = arith.addf %465, %457 : vector<8x128xf32>
      %469 = vector.extract_strided_slice %468 {offsets = [0, 0], sizes = [8, 32], strides = [1, 1]} : vector<8x128xf32> to vector<8x32xf32>
      %470 = arith.negf %469 : vector<8x32xf32>
      %471 = math.exp %470 : vector<8x32xf32>
      %cst_109 = arith.constant 1.000000e+00 : f32
      %472 = vector.broadcast %cst_109 : f32 to vector<8x32xf32>
      %473 = arith.addf %472, %471 : vector<8x32xf32>
      %474 = arith.divf %472, %473 : vector<8x32xf32>
      %475 = vector.extract_strided_slice %468 {offsets = [0, 32], sizes = [8, 32], strides = [1, 1]} : vector<8x128xf32> to vector<8x32xf32>
      %476 = arith.negf %475 : vector<8x32xf32>
      %477 = math.exp %476 : vector<8x32xf32>
      %cst_110 = arith.constant 1.000000e+00 : f32
      %478 = vector.broadcast %cst_110 : f32 to vector<8x32xf32>
      %479 = arith.addf %478, %477 : vector<8x32xf32>
      %480 = arith.divf %478, %479 : vector<8x32xf32>
      %481 = vector.extract_strided_slice %468 {offsets = [0, 64], sizes = [8, 32], strides = [1, 1]} : vector<8x128xf32> to vector<8x32xf32>
      %482 = math.tanh %481 : vector<8x32xf32>
      %483 = vector.extract_strided_slice %468 {offsets = [0, 96], sizes = [8, 32], strides = [1, 1]} : vector<8x128xf32> to vector<8x32xf32>
      %484 = arith.negf %483 : vector<8x32xf32>
      %485 = math.exp %484 : vector<8x32xf32>
      %cst_111 = arith.constant 1.000000e+00 : f32
      %486 = vector.broadcast %cst_111 : f32 to vector<8x32xf32>
      %487 = arith.addf %486, %485 : vector<8x32xf32>
      %488 = arith.divf %486, %487 : vector<8x32xf32>
      %489 = arith.mulf %480, %428 : vector<8x32xf32>
      %490 = arith.mulf %474, %482 : vector<8x32xf32>
      %491 = arith.addf %489, %490 : vector<8x32xf32>
      %492 = math.tanh %491 : vector<8x32xf32>
      %493 = arith.mulf %488, %492 : vector<8x32xf32>
      %494 = arith.addf %467, %458 : vector<8x128xf32>
      %495 = vector.extract_strided_slice %494 {offsets = [0, 0], sizes = [8, 32], strides = [1, 1]} : vector<8x128xf32> to vector<8x32xf32>
      %496 = arith.negf %495 : vector<8x32xf32>
      %497 = math.exp %496 : vector<8x32xf32>
      %cst_112 = arith.constant 1.000000e+00 : f32
      %498 = vector.broadcast %cst_112 : f32 to vector<8x32xf32>
      %499 = arith.addf %498, %497 : vector<8x32xf32>
      %500 = arith.divf %498, %499 : vector<8x32xf32>
      %501 = vector.extract_strided_slice %494 {offsets = [0, 32], sizes = [8, 32], strides = [1, 1]} : vector<8x128xf32> to vector<8x32xf32>
      %502 = arith.negf %501 : vector<8x32xf32>
      %503 = math.exp %502 : vector<8x32xf32>
      %cst_113 = arith.constant 1.000000e+00 : f32
      %504 = vector.broadcast %cst_113 : f32 to vector<8x32xf32>
      %505 = arith.addf %504, %503 : vector<8x32xf32>
      %506 = arith.divf %504, %505 : vector<8x32xf32>
      %507 = vector.extract_strided_slice %494 {offsets = [0, 64], sizes = [8, 32], strides = [1, 1]} : vector<8x128xf32> to vector<8x32xf32>
      %508 = math.tanh %507 : vector<8x32xf32>
      %509 = vector.extract_strided_slice %494 {offsets = [0, 96], sizes = [8, 32], strides = [1, 1]} : vector<8x128xf32> to vector<8x32xf32>
      %510 = arith.negf %509 : vector<8x32xf32>
      %511 = math.exp %510 : vector<8x32xf32>
      %cst_114 = arith.constant 1.000000e+00 : f32
      %512 = vector.broadcast %cst_114 : f32 to vector<8x32xf32>
      %513 = arith.addf %512, %511 : vector<8x32xf32>
      %514 = arith.divf %512, %513 : vector<8x32xf32>
      %515 = arith.mulf %506, %454 : vector<8x32xf32>
      %516 = arith.mulf %500, %508 : vector<8x32xf32>
      %517 = arith.addf %515, %516 : vector<8x32xf32>
      %518 = math.tanh %517 : vector<8x32xf32>
      %519 = arith.mulf %514, %518 : vector<8x32xf32>
      %c8_i32_115 = arith.constant 8 : i32
      %c0_116 = arith.constant 0 : index
      %c0_117 = arith.constant 0 : index
      %520 = vector.load %arg6[%c0_116, %c0_117] : memref<32x32xf32, #tpu.memory_space<vmem>>, vector<32x32xf32>
      %cst_118 = arith.constant dense<0.000000e+00> : vector<8x32xf32>
      %521 = tpu.matmul %493, %520, %cst_118 {dimension_numbers = #tpu.dot_dimension_numbers<[1], [0], [0], [1], [0, 0, 1, 1], [], []>} : vector<8x32xf32>, vector<32x32xf32>, vector<8x32xf32> -> vector<8x32xf32>
      %c0_119 = arith.constant 0 : index
      %c0_120 = arith.constant 0 : index
      %522 = vector.load %arg7[%c0_119, %c0_120] : memref<32x32xf32, #tpu.memory_space<vmem>>, vector<32x32xf32>
      %cst_121 = arith.constant dense<0.000000e+00> : vector<8x32xf32>
      %523 = tpu.matmul %519, %522, %cst_121 {dimension_numbers = #tpu.dot_dimension_numbers<[1], [0], [0], [1], [0, 0, 1, 1], [], []>} : vector<8x32xf32>, vector<32x32xf32>, vector<8x32xf32> -> vector<8x32xf32>
      %524 = arith.addf %521, %523 : vector<8x32xf32>
      %c0_122 = arith.constant 0 : index
      %c0_123 = arith.constant 0 : index
      %525 = vector.load %arg8[%c0_122, %c0_123] : memref<1x32xf32, #tpu.memory_space<vmem>>, vector<1x32xf32>
      %526 = vector.broadcast %525 : vector<1x32xf32> to vector<8x32xf32>
      %527 = arith.addf %524, %526 : vector<8x32xf32>
      %c0_124 = arith.constant 0 : index
      %c0_125 = arith.constant 0 : index
      %528 = vector.load %arg9[%c0_124, %c0_125] : memref<8x32xf32, #tpu.memory_space<vmem>>, vector<8x32xf32>
      tpu.vector_store %arg9[%c0_124, %c0_125], %527 {strides = array<i32>} : memref<8x32xf32, #tpu.memory_space<vmem>>, vector<8x32xf32>,
    } else {
    }
    return
  }
  func.func @transform_0(%arg0: i32) -> (i32, i32) {
    %c0_i32 = arith.constant 0 : i32
    %c0_i32_0 = arith.constant 0 : i32
    return %arg0, %c0_i32 : i32, i32
  }
  func.func @transform_1(%arg0: i32) -> (i32, i32) {
    %c0_i32 = arith.constant 0 : i32
    %c0_i32_0 = arith.constant 0 : i32
    %c0_i32_1 = arith.constant 0 : i32
    return %c0_i32, %c0_i32_0 : i32, i32
  }
  func.func @transform_2(%arg0: i32) -> (i32, i32) {
    %c0_i32 = arith.constant 0 : i32
    %c0_i32_0 = arith.constant 0 : i32
    %c0_i32_1 = arith.constant 0 : i32
    return %c0_i32, %c0_i32_0 : i32, i32
  }
  func.func @transform_3(%arg0: i32) -> (i32, i32) {
    %c0_i32 = arith.constant 0 : i32
    %c0_i32_0 = arith.constant 0 : i32
    %c0_i32_1 = arith.constant 0 : i32
    return %c0_i32, %c0_i32_0 : i32, i32
  }
  func.func @transform_4(%arg0: i32) -> (i32, i32) {
    %c0_i32 = arith.constant 0 : i32
    %c0_i32_0 = arith.constant 0 : i32
    %c0_i32_1 = arith.constant 0 : i32
    return %c0_i32, %c0_i32_0 : i32, i32
  }
  func.func @transform_5(%arg0: i32) -> (i32, i32) {
    %c0_i32 = arith.constant 0 : i32
    %c0_i32_0 = arith.constant 0 : i32
    %c0_i32_1 = arith.constant 0 : i32
    return %c0_i32, %c0_i32_0 : i32, i32
  }
  func.func @transform_6(%arg0: i32) -> (i32, i32) {
    %c0_i32 = arith.constant 0 : i32
    %c0_i32_0 = arith.constant 0 : i32
    %c0_i32_1 = arith.constant 0 : i32
    return %c0_i32, %c0_i32_0 : i32, i32
  }
  func.func @transform_7(%arg0: i32) -> (i32, i32) {
    %c0_i32 = arith.constant 0 : i32
    %c0_i32_0 = arith.constant 0 : i32
    %c0_i32_1 = arith.constant 0 : i32
    return %c0_i32, %c0_i32_0 : i32, i32
  }
  func.func @transform_8(%arg0: i32) -> (i32, i32) {
    %c0_i32 = arith.constant 0 : i32
    %c0_i32_0 = arith.constant 0 : i32
    %c0_i32_1 = arith.constant 0 : i32
    return %c0_i32, %c0_i32_0 : i32, i32
  }
}

</mosaic_0001>

<bundles_post_ra>
// kernel: bilstm_encoder.1
= control target key start
LH: loop header
LB: loop body
LE: loop exit
PB: predicated region body
PF: predicated region fallthrough
CT: control target
= control target key end

     0   :  { %s2820_s27 = smov 0   ;;  %s3227_s0 = inlined_call_operand.vmem [shape: f32[64,16], index: 0, kind: input, shape index: {}]   ;;  %s3228_s1 = inlined_call_operand.vmem [shape: f32[16,256], index: 1, kind: input, shape index: {}]   ;;  %s3229_s2 = inlined_call_operand.vmem [shape: f32[1,256], index: 2, kind: input, shape index: {}]   ;;  %s3230_s3 = inlined_call_operand.vmem [shape: f32[32,128], index: 3, kind: input, shape index: {}]   ;;  %s3231_s4 = inlined_call_operand.vmem [shape: f32[32,128], index: 4, kind: input, shape index: {}]   ;;  %s3232_s5 = inlined_call_operand.vmem [shape: f32[32,32], index: 5, kind: input, shape index: {}]   ;;  %s3233_s6 = inlined_call_operand.vmem [shape: f32[32,32], index: 6, kind: input, shape index: {}]   ;;  %s3234_s7 = inlined_call_operand.vmem [shape: f32[1,32], index: 7, kind: input, shape index: {}]   ;;  %s3235_s8 = inlined_call_operand.vmem [shape: f32[8,32], index: 8, kind: output, shape index: {}]  }
   0x1 LB: > { %s2826_s28 = sadd.s32 4294967295, %s2768_s27   ;;  %p2282_p0 = scmp.ge.s32.totalorder %s2768_s27, 1  ;;  %s2768_s27 = sphi %s2820_s27, %s18_s27  }
   0x2   : > { %p258_p1 = scmp.lt.s32.totalorder %s2768_s27, 3 }
   0x4   : > { %p259_p2 = pnand %p2282_p0, %p258_p1 }
   0x5   : > { %s2283_s13 = sshll.u32 (!%p259_p2), %s2826_s28, 2  ;;  %s2289_s20 = sshll.u32 (!%p259_p2), %s2826_s28, 5 }
   0x6   : > { %262 = sbr.rel (%p259_p2) target bundleno = 5942 (0x1736), region = 52  ;;  %p288_p3 = scmp.lt.s32.totalorder (!%p259_p2), %s2283_s13, 7 }
   0x7   : > { %s416_s23 = sshra.s32 (!%p259_p2), %s2289_s20, 3  ;;  %p2292_p4 = scmp.ne.s32.totalorder (!%p259_p2), %s2826_s28, 1 }
   0x8   : > { %s2328_s24 = sshll.u32 (!%p259_p2), %s416_s23, 4 }
   0x9   : > { %s420_s25 = scalar_lea.vmem (!%p259_p2), [#allocation2], %s2328_s24 }
   0xb   : > { %v300_v0 = vld [vmem:[%s3228_s1 + $0x18] sm:$0xff]  ;;  %v299_v1 = vld [vmem:[%s3228_s1 + $0x10] sm:$0xff]  ;;  %v298_v2 = vld [vmem:[%s3228_s1 + $0x8] sm:$0xff]  ;;  %s3237_s13 = smov (!%p288_p3, %s2283_s13), 7  ;;  %v2770_v4 = vmov 0.0   ;;  %vm313_vm0 = vcmask 130048   ;;  %v303_v9 = vlaneseq }
   0xc   : > { %354 = vmatprep.subr.mxu0 %v300_v0  ;;  %2617 = vmatprep.subr.mxu1 %v300_v0  ;;  %v297_v3 = vld [vmem:[%s3228_s1] sm:$0xff]  ;;  %s2284_s16 = sshll.u32 %s3237_s13, 3  ;;  %s2773_s21 = smov (!%p2292_p4), 64  }
   0xd   : > { %355 = vmatpush1.msra.mxu0 %v299_v1  ;;  %2619 = vmatpush1.msra.mxu1 %v299_v1  ;;  %s291_s19 = scalar_lea.vmem %s3227_s0, %s2284_s16  ;;  %v304_v10 = vshrl.u32 %v303_v9, 7  ;;  %v301_v12 = vld [vmem:[%s3229_s2] sm:$0x3]  ;;  %s2774_s22 = smov (!%p2292_p4), 32  }
   0xe   : > { %356 = vmatprep.subr.mxu0 %v298_v2  ;;  %2618 = vmatprep.subr.mxu1 %v298_v2  ;;  %v293_v5 = vld [vmem:[%s291_s19] sm:$0xff]  ;;  %v295_v6 = vld [vmem:[%s291_s19 + $0x10] sm:$0xff]  ;;  %v294_v7 = vld [vmem:[%s291_s19 + $0x8] sm:$0xff] }
   0xf   : > { %357 = vmatpush1.msra.mxu0 %v297_v3  ;;  %2620 = vmatpush1.msra.mxu1 %v297_v3  ;;  %v296_v8 = vld [vmem:[%s291_s19 + $0x18] sm:$0xff]  ;;  %v305_v11 = vsub.s32 0, %v304_v10  ;;  %v309_v13 = vsub.s32 1, %v304_v10 }
  0x10   : > { %390 = vmatprep.mubr.f32.mxu0 %v2770_v4  ;;  %402 = vmatprep.mubr.f32.mxu1 %v2770_v4 }
  0x11   : > { %2285 = vmatmul.mubr.msk.f32.vlgmr.msra.gmra.mxu0 %vm313_vm0, %v293_v5  ;;  %2287 = vmatmul.mubr.msk.f32.vlgmr.msra.gmra.mxu1 %vm313_vm0, %v295_v6  ;;  %v306_v14 = vrot.slane %v301_v12, %v305_v11  ;;  %v310_v15 = vrot.slane %v301_v12, %v309_v13 }
  0x12   : > { %396 = vmatprep.mubr.f32.mxu0 %v2770_v4  ;;  %408 = vmatprep.mubr.f32.mxu1 %v2770_v4 }
  0x15   : > { %2286 = vmatmul.mubr.msk.f32.gmra.mxu0 %vm313_vm0, %v294_v7  ;;  %2288 = vmatmul.mubr.msk.f32.gmra.mxu1 %vm313_vm0, %v296_v8 }
  0xd1   : > { %v392_v16 = vpop.f32.mrf.mxu0  ;;  %v404_v17 = vpop.f32.mrf.mxu1 }
  0xd2   : > { %v393_v18 = vadd.f32 %v392_v16, %v306_v14  ;;  %v405_v19 = vadd.f32 %v404_v17, %v306_v14 }
  0xd3   : > { %v394_v20 = vpop.f32.mrf.mxu0  ;;  %v406_v21 = vpop.f32.mrf.mxu1 }
  0xd4   : > { %421 = vst [vmem:[%s420_s25] sm:$0xff] %v393_v18  ;;  %425 = vst [vmem:[%s420_s25 + $0x20] sm:$0xff] %v405_v19  ;;  %v395_v22 = vadd.f32 %v394_v20, %v310_v15  ;;  %v407_v23 = vadd.f32 %v406_v21, %v310_v15 }
  0xd5   : > { %v398_v24 = vpop.f32.mrf.mxu0  ;;  %v410_v25 = vpop.f32.mrf.mxu1 }
  0xd6   : > { %422 = vst [vmem:[%s420_s25 + $0x8] sm:$0xff] %v395_v22  ;;  %426 = vst [vmem:[%s420_s25 + $0x28] sm:$0xff] %v407_v23  ;;  %v399_v26 = vadd.f32 %v398_v24, %v306_v14  ;;  %v411_v27 = vadd.f32 %v410_v25, %v306_v14  ;;  %432 = sbr.rel (%p2292_p4) target bundleno = 5942 (0x1736), region = 56 }
  0xd7   : > { %v400_v28 = vpop.f32.mrf.mxu0  ;;  %v412_v29 = vpop.f32.mrf.mxu1 }
  0xd8   : > { %423 = vst [vmem:[%s420_s25 + $0x10] sm:$0xff] %v399_v26  ;;  %427 = vst [vmem:[%s420_s25 + $0x30] sm:$0xff] %v411_v27  ;;  %v401_v30 = vadd.f32 %v400_v28, %v310_v15  ;;  %v413_v31 = vadd.f32 %v412_v29, %v310_v15 }
  0xda   : > { %424 = vst [vmem:[%s420_s25 + $0x18] sm:$0xff] %v401_v30  ;;  %428 = vst [vmem:[%s420_s25 + $0x38] sm:$0xff] %v413_v31 }
  0xdb   : > { %v2854_v32 = vld [vmem:[%s3230_s3 + $0x18] sm:$0xff]  ;;  %v2771_v34 = vmov 0.0   ;;  %v2866_v35 = vld [vmem:[%s3230_s3 + $0x10] sm:$0xff]  ;;  %v2880_v37 = vld [vmem:[%s3230_s3 + $0x8] sm:$0xff]  ;;  %vm2772_vm1 = vmmov 0   ;;  %vm441_vm2 = vcmask 261120  }
  0xdc   : > { %v2859_v33 = vld [vmem:[%s3231_s4 + $0x18] sm:$0xff]  ;;  %2419 = vmatprep.subr.mxu0 %v2771_v34  ;;  %2430 = vmatprep.subr.mxu1 %v2771_v34  ;;  %v2871_v36 = vld [vmem:[%s3231_s4 + $0x10] sm:$0xff]  ;;  %v2887_v38 = vld [vmem:[%s3231_s4 + $0x8] sm:$0xff] }
  0xdd   : > { %2420 = vmatpush3.msra.mxu0 %v2854_v32  ;;  %2431 = vmatpush3.msra.mxu1 %v2859_v33  ;;  %v2894_v39 = vld [vmem:[%s3230_s3] sm:$0xff] }
  0xde   : > { %2421 = vmatprep.subr.mxu0 %v2771_v34  ;;  %2432 = vmatprep.subr.mxu1 %v2771_v34  ;;  %v2902_v40 = vld [vmem:[%s3231_s4] sm:$0xff] }
  0xdf   : > { %2422 = vmatpush3.msra.mxu0 %v2866_v35  ;;  %2433 = vmatpush3.msra.mxu1 %v2871_v36 }
  0xe0   : > { %2423 = vmatprep.subr.mxu0 %v2771_v34  ;;  %2434 = vmatprep.subr.mxu1 %v2771_v34 }
  0xe1   : > { %2424 = vmatpush3.msra.mxu0 %v2880_v37  ;;  %2427 = vmatprep.mubr.msk.f32.mxu0 %vm2772_vm1, %v2771_v34  ;;  %v588_v41 = vld [vmem:[#allocation2] sm:$0xff]  ;;  %v592_v43 = vld [vmem:[#allocation2 + $0x78] sm:$0xff]  ;;  %v796_v13 = vld [vmem:[#allocation2 + $0x10] sm:$0xff] }
  0xe2   : > { %2425 = vmatprep.subr.mxu0 %v2771_v34  ;;  %2435 = vmatpush3.msra.mxu1 %v2887_v38  ;;  %v800_v17 = vld [vmem:[#allocation2 + $0x68] sm:$0xff] }
  0xe3   : > { %2426 = vmatpush3.msra.mxu0 %v2894_v39  ;;  %2436 = vmatprep.subr.mxu1 %v2771_v34 }
  0xe4   : > { %2428 = vmatmul.mubr.f32.vlgmr.msra.gmra.mxu0 %v2771_v34  ;;  %2437 = vmatpush3.msra.mxu1 %v2902_v40 }
  0xe5   : > { %2438 = vmatprep.mubr.msk.f32.mxu1 %vm2772_vm1, %v2771_v34  ;;  %2441 = vmatprep.subr.mxu0 %v2771_v34 }
  0xe6   : > { %2439 = vmatmul.mubr.f32.vlgmr.msra.gmra.mxu1 %v2771_v34  ;;  %2442 = vmatpush3.msra.mxu0 %v2854_v32 }
  0xe7   : > { %2443 = vmatprep.subr.mxu0 %v2771_v34  ;;  %2452 = vmatprep.subr.mxu1 %v2771_v34 }
  0xe8   : > { %2444 = vmatpush3.msra.mxu0 %v2866_v35  ;;  %2453 = vmatpush3.msra.mxu1 %v2859_v33 }
  0xe9   : > { %2445 = vmatprep.subr.mxu0 %v2771_v34  ;;  %2454 = vmatprep.subr.mxu1 %v2771_v34 }
  0xea   : > { %2446 = vmatpush3.msra.mxu0 %v2880_v37  ;;  %2449 = vmatprep.mubr.msk.f32.mxu0 %vm2772_vm1, %v2771_v34 }
  0xeb   : > { %2447 = vmatprep.subr.mxu0 %v2771_v34  ;;  %2455 = vmatpush3.msra.mxu1 %v2871_v36 }
  0xec   : > { %2448 = vmatpush3.msra.mxu0 %v2894_v39  ;;  %2456 = vmatprep.subr.mxu1 %v2771_v34 }
  0xed   : > { %2457 = vmatpush3.msra.mxu1 %v2887_v38  ;;  %2460 = vmatprep.mubr.msk.f32.mxu1 %vm2772_vm1, %v2771_v34 }
  0xee   : > { %2458 = vmatprep.subr.mxu1 %v2771_v34  ;;  %2463 = vmatprep.subr.mxu0 %v2771_v34 }
  0xef   : > { %2459 = vmatpush3.msra.mxu1 %v2902_v40 }
  0xf0   : > { %2474 = vmatprep.subr.mxu1 %v2771_v34 }
 0x1a4   : > { %v511_v42 = vpop.f32.mrf.mxu0 }
 0x1a5   : > { %v593_v44 = vadd.f32 %v588_v41, %v511_v42 }
 0x1a6   : > { %v2429_v45 = vpop.f32.mrf.mxu0  ;;  %v581_v46 = vpop.f32.mrf.mxu1 }
 0x1a7   : > { %2634 = vtanh.f32 %v593_v44  ;;  %v618_v47 = vadd.f32 %v592_v43, %v581_v46  ;;  %v2293_v51 = vmul.f32 -1.442695, %v593_v44 }
 0x1a8   : > { %v2440_v48 = vpop.f32.mrf.mxu1 }
 0x1a9   : > { %2636 = vtanh.f32 %v618_v47  ;;  %v2294_v52 = vmul.f32 -1.442695, %v618_v47 }
 0x1aa   : > { %2638 = vpow2.f32 %v2293_v51 }
 0x1ab   : > { %2640 = vpow2.f32 %v2294_v52 }
 0x1b4   : > { %v2635_v49 = vpop.eup %2634 }
 0x1b5   : > { %603 = vrot.lane.b32.xlu0 %v2635_v49, %s2773_s21 }
 0x1b6   : > { %v2637_v50 = vpop.eup %2636 }
 0x1b7   : > { %v2639_v53 = vpop.eup %2638 }
 0x1b8   : > { %v597_v54 = vadd.f32 1.0, %v2639_v53  ;;  %v2641_v55 = vpop.eup %2640 }
 0x1b9   : > { %628 = vrot.lane.b32.xlu0 %v2637_v50, %s2773_s21  ;;  %v622_v56 = vadd.f32 1.0, %v2641_v55 }
 0x1ba   : > { %2642 = vrcp.f32 %v597_v54 }
 0x1bb   : > { %2644 = vrcp.f32 %v622_v56 }
 0x1c7   : > { %v2643_v57 = vpop.eup %2642 }
 0x1c8   : > { %v2645_v60 = vpop.eup %2644  ;;  %v601_v63 = vmul.f32 0.0, %v2643_v57 }
 0x1c9   : > { %v626_v2 = vmul.f32 0.0, %v2645_v60 }
 0x227   : > { %v604_v58 = vpop.permute.xlu0 %603 }
 0x228   : > { %v606_v59 = vmul.f32 %v2643_v57, %v604_v58  ;;  %v1004_v58 = vld [vmem:[#allocation2 + $0x20] sm:$0xff] }
 0x22a   : > { %608 = vrot.lane.b32.xlu1 %v606_v59, %s2774_s22 }
 0x22b   : > { %v629_v61 = vpop.permute.xlu0 %628 }
 0x22c   : > { %v631_v62 = vmul.f32 %v2645_v60, %v629_v61 }
 0x22e   : > { %633 = vrot.lane.b32.xlu1 %v631_v62, %s2774_s22  ;;  %v1008_v62 = vld [vmem:[#allocation2 + $0x58] sm:$0xff] }
 0x29c   : > { %v609_v0 = vpop.permute.xlu1 %608 }
 0x29d   : > { %v2939_v1 = vadd.f32 %v609_v0, %v601_v63 }
 0x29f   : > { %2646 = vtanh.f32 %v2939_v1 }
 0x2a0   : > { %v634_v3 = vpop.permute.xlu1 %633 }
 0x2a1   : > { %v2942_v4 = vadd.f32 %v634_v3, %v626_v2 }
 0x2a3   : > { %2648 = vtanh.f32 %v2942_v4 }
 0x2ac   : > { %v2647_v5 = vpop.eup %2646 }
 0x2ad   : > { %614 = vrot.lane.b32.xlu0 %v2647_v5, %s2773_s21 }
 0x2b0   : > { %v2649_v6 = vpop.eup %2648 }
 0x2b1   : > { %639 = vrot.lane.b32.xlu1 %v2649_v6, %s2773_s21 }
 0x31f   : > { %v615_v7 = vpop.permute.xlu0 %614 }
 0x320   : > { %v617_v8 = vmul.f32 %v2643_v57, %v615_v7 }
 0x322   : > { %644 = vrot.lane.b32.xlu0 %v617_v8, %s2774_s22 }
 0x323   : > { %v640_v9 = vpop.permute.xlu1 %639 }
 0x324   : > { %v642_v10 = vmul.f32 %v2645_v60, %v640_v9 }
 0x326   : > { %719 = vrot.lane.b32.xlu1 %v642_v10, %s2774_s22 }
 0x394   : > { %v645_v11 = vpop.permute.xlu0 %644 }
 0x395   : > { %2450 = vmatmul.mubr.msk.f32.vlgmr.msra.gmra.mxu0 %vm441_vm2, %v645_v11 }
 0x396   : > { %2464 = vmatpush3.msra.mxu0 %v2854_v32  ;;  %2471 = vmatprep.mubr.msk.f32.mxu0 %vm2772_vm1, %v2771_v34 }
 0x397   : > { %2465 = vmatprep.subr.mxu0 %v2771_v34 }
 0x398   : > { %v720_v12 = vpop.permute.xlu1 %719  ;;  %2466 = vmatpush3.msra.mxu0 %v2866_v35 }
 0x399   : > { %2461 = vmatmul.mubr.msk.f32.vlgmr.msra.gmra.mxu1 %vm441_vm2, %v720_v12  ;;  %2467 = vmatprep.subr.mxu0 %v2771_v34 }
 0x39a   : > { %2468 = vmatpush3.msra.mxu0 %v2880_v37  ;;  %2475 = vmatpush3.msra.mxu1 %v2859_v33 }
 0x39b   : > { %2469 = vmatprep.subr.mxu0 %v2771_v34  ;;  %2476 = vmatprep.subr.mxu1 %v2771_v34 }
 0x39c   : > { %2470 = vmatpush3.msra.mxu0 %v2894_v39  ;;  %2477 = vmatpush3.msra.mxu1 %v2871_v36 }
 0x39d   : > { %2478 = vmatprep.subr.mxu1 %v2771_v34  ;;  %2482 = vmatprep.mubr.msk.f32.mxu1 %vm2772_vm1, %v2771_v34 }
 0x39e   : > { %2479 = vmatpush3.msra.mxu1 %v2887_v38  ;;  %2485 = vmatprep.subr.mxu0 %v2771_v34 }
 0x39f   : > { %2480 = vmatprep.subr.mxu1 %v2771_v34 }
 0x3a0   : > { %2481 = vmatpush3.msra.mxu1 %v2902_v40 }
 0x3a1   : > { %2496 = vmatprep.subr.mxu1 %v2771_v34 }
 0x455   : > { %v714_v14 = vpop.f32.mrf.mxu0 }
 0x456   : > { %v801_v15 = vadd.f32 %v796_v13, %v714_v14 }
 0x457   : > { %v2451_v16 = vpop.f32.mrf.mxu0 }
 0x458   : > { %2650 = vtanh.f32 %v801_v15  ;;  %v2297_v23 = vmul.f32 -1.442695, %v801_v15 }
 0x459   : > { %v789_v18 = vpop.f32.mrf.mxu1 }
 0x45a   : > { %v826_v19 = vadd.f32 %v800_v17, %v789_v18 }
 0x45b   : > { %v2462_v20 = vpop.f32.mrf.mxu1 }
 0x45c   : > { %2652 = vtanh.f32 %v826_v19  ;;  %v2298_v24 = vmul.f32 -1.442695, %v826_v19 }
 0x45d   : > { %2654 = vpow2.f32 %v2297_v23 }
 0x45e   : > { %2656 = vpow2.f32 %v2298_v24 }
 0x465   : > { %v2651_v21 = vpop.eup %2650 }
 0x466   : > { %811 = vrot.lane.b32.xlu0 %v2651_v21, %s2773_s21 }
 0x469   : > { %v2653_v22 = vpop.eup %2652 }
 0x46a   : > { %836 = vrot.lane.b32.xlu1 %v2653_v22, %s2773_s21  ;;  %v2655_v25 = vpop.eup %2654 }
 0x46b   : > { %v805_v26 = vadd.f32 1.0, %v2655_v25  ;;  %v2657_v27 = vpop.eup %2656 }
 0x46c   : > { %v830_v28 = vadd.f32 1.0, %v2657_v27 }
 0x46d   : > { %2658 = vrcp.f32 %v805_v26 }
 0x46e   : > { %2660 = vrcp.f32 %v830_v28 }
 0x47a   : > { %v2659_v29 = vpop.eup %2658 }
 0x47b   : > { %v2661_v41 = vpop.eup %2660  ;;  %v809_v44 = vmul.f32 %v2659_v29, %v2939_v1 }
 0x47c   : > { %v834_v47 = vmul.f32 %v2661_v41, %v2942_v4 }
 0x4d8   : > { %v812_v30 = vpop.permute.xlu0 %811 }
 0x4d9   : > { %v814_v31 = vmul.f32 %v2659_v29, %v812_v30  ;;  %v1212_v30 = vld [vmem:[#allocation2 + $0x30] sm:$0xff] }
 0x4db   : > { %816 = vrot.lane.b32.xlu0 %v814_v31, %s2774_s22 }
 0x4dc   : > { %v837_v42 = vpop.permute.xlu1 %836 }
 0x4dd   : > { %v839_v43 = vmul.f32 %v2661_v41, %v837_v42 }
 0x4df   : > { %841 = vrot.lane.b32.xlu1 %v839_v43, %s2774_s22  ;;  %v1216_v43 = vld [vmem:[#allocation2 + $0x48] sm:$0xff] }
 0x54d   : > { %v817_v45 = vpop.permute.xlu0 %816 }
 0x54e   : > { %v2976_v46 = vadd.f32 %v817_v45, %v809_v44 }
 0x550   : > { %2662 = vtanh.f32 %v2976_v46 }
 0x551   : > { %v842_v48 = vpop.permute.xlu1 %841 }
 0x552   : > { %v2980_v49 = vadd.f32 %v842_v48, %v834_v47 }
 0x554   : > { %2664 = vtanh.f32 %v2980_v49 }
 0x55d   : > { %v2663_v50 = vpop.eup %2662 }
 0x55e   : > { %822 = vrot.lane.b32.xlu0 %v2663_v50, %s2773_s21 }
 0x561   : > { %v2665_v51 = vpop.eup %2664 }
 0x562   : > { %847 = vrot.lane.b32.xlu1 %v2665_v51, %s2773_s21 }
 0x5d0   : > { %v823_v52 = vpop.permute.xlu0 %822 }
 0x5d1   : > { %v825_v53 = vmul.f32 %v2659_v29, %v823_v52 }
 0x5d3   : > { %852 = vrot.lane.b32.xlu0 %v825_v53, %s2774_s22 }
 0x5d4   : > { %v848_v54 = vpop.permute.xlu1 %847 }
 0x5d5   : > { %v850_v55 = vmul.f32 %v2661_v41, %v848_v54 }
 0x5d7   : > { %927 = vrot.lane.b32.xlu1 %v850_v55, %s2774_s22 }
 0x645   : > { %v853_v56 = vpop.permute.xlu0 %852 }
 0x646   : > { %2472 = vmatmul.mubr.msk.f32.vlgmr.msra.gmra.mxu0 %vm441_vm2, %v853_v56 }
 0x647   : > { %2486 = vmatpush3.msra.mxu0 %v2854_v32  ;;  %2493 = vmatprep.mubr.msk.f32.mxu0 %vm2772_vm1, %v2771_v34 }
 0x648   : > { %2487 = vmatprep.subr.mxu0 %v2771_v34 }
 0x649   : > { %v928_v57 = vpop.permute.xlu1 %927  ;;  %2488 = vmatpush3.msra.mxu0 %v2866_v35 }
 0x64a   : > { %2483 = vmatmul.mubr.msk.f32.vlgmr.msra.gmra.mxu1 %vm441_vm2, %v928_v57  ;;  %2489 = vmatprep.subr.mxu0 %v2771_v34 }
 0x64b   : > { %2490 = vmatpush3.msra.mxu0 %v2880_v37  ;;  %2497 = vmatpush3.msra.mxu1 %v2859_v33 }
 0x64c   : > { %2491 = vmatprep.subr.mxu0 %v2771_v34  ;;  %2498 = vmatprep.subr.mxu1 %v2771_v34 }
 0x64d   : > { %2492 = vmatpush3.msra.mxu0 %v2894_v39  ;;  %2499 = vmatpush3.msra.mxu1 %v2871_v36 }
 0x64e   : > { %2500 = vmatprep.subr.mxu1 %v2771_v34  ;;  %2504 = vmatprep.mubr.msk.f32.mxu1 %vm2772_vm1, %v2771_v34 }
 0x64f   : > { %2501 = vmatpush3.msra.mxu1 %v2887_v38  ;;  %2507 = vmatprep.subr.mxu0 %v2771_v34 }
 0x650   : > { %2502 = vmatprep.subr.mxu1 %v2771_v34 }
 0x651   : > { %2503 = vmatpush3.msra.mxu1 %v2902_v40 }
 0x652   : > { %2518 = vmatprep.subr.mxu1 %v2771_v34 }
 0x706   : > { %v922_v59 = vpop.f32.mrf.mxu0 }
 0x707   : > { %v1009_v60 = vadd.f32 %v1004_v58, %v922_v59 }
 0x708   : > { %v2473_v61 = vpop.f32.mrf.mxu0 }
 0x709   : > { %2666 = vtanh.f32 %v1009_v60  ;;  %v2301_v4 = vmul.f32 -1.442695, %v1009_v60 }
 0x70a   : > { %v997_v63 = vpop.f32.mrf.mxu1 }
 0x70b   : > { %v1034_v0 = vadd.f32 %v1008_v62, %v997_v63 }
 0x70c   : > { %v2484_v1 = vpop.f32.mrf.mxu1 }
 0x70d   : > { %2668 = vtanh.f32 %v1034_v0  ;;  %v2302_v5 = vmul.f32 -1.442695, %v1034_v0 }
 0x70e   : > { %2670 = vpow2.f32 %v2301_v4 }
 0x70f   : > { %2672 = vpow2.f32 %v2302_v5 }
 0x716   : > { %v2667_v2 = vpop.eup %2666 }
 0x717   : > { %1019 = vrot.lane.b32.xlu0 %v2667_v2, %s2773_s21 }
 0x71a   : > { %v2669_v3 = vpop.eup %2668 }
 0x71b   : > { %1044 = vrot.lane.b32.xlu1 %v2669_v3, %s2773_s21  ;;  %v2671_v6 = vpop.eup %2670 }
 0x71c   : > { %v1013_v7 = vadd.f32 1.0, %v2671_v6  ;;  %v2673_v8 = vpop.eup %2672 }
 0x71d   : > { %v1038_v9 = vadd.f32 1.0, %v2673_v8 }
 0x71e   : > { %2674 = vrcp.f32 %v1013_v7 }
 0x71f   : > { %2676 = vrcp.f32 %v1038_v9 }
 0x72b   : > { %v2675_v10 = vpop.eup %2674 }
 0x72c   : > { %v2677_v13 = vpop.eup %2676  ;;  %v1017_v16 = vmul.f32 %v2675_v10, %v2976_v46 }
 0x72d   : > { %v1042_v19 = vmul.f32 %v2677_v13, %v2980_v49 }
 0x789   : > { %v1020_v11 = vpop.permute.xlu0 %1019 }
 0x78a   : > { %v1022_v12 = vmul.f32 %v2675_v10, %v1020_v11  ;;  %v1417_v11 = vld [vmem:[#allocation2 + $0x40] sm:$0xff] }
 0x78c   : > { %1024 = vrot.lane.b32.xlu0 %v1022_v12, %s2774_s22 }
 0x78d   : > { %v1045_v14 = vpop.permute.xlu1 %1044 }
 0x78e   : > { %v1047_v15 = vmul.f32 %v2677_v13, %v1045_v14 }
 0x790   : > { %1049 = vrot.lane.b32.xlu1 %v1047_v15, %s2774_s22  ;;  %v1418_v15 = vld [vmem:[#allocation2 + $0x38] sm:$0xff] }
 0x7fe   : > { %v1025_v17 = vpop.permute.xlu0 %1024 }
 0x7ff   : > { %v3014_v18 = vadd.f32 %v1025_v17, %v1017_v16 }
 0x801   : > { %2678 = vtanh.f32 %v3014_v18 }
 0x802   : > { %v1050_v20 = vpop.permute.xlu1 %1049 }
 0x803   : > { %v3018_v21 = vadd.f32 %v1050_v20, %v1042_v19 }
 0x805   : > { %2680 = vtanh.f32 %v3018_v21 }
 0x80e   : > { %v2679_v22 = vpop.eup %2678 }
 0x80f   : > { %1030 = vrot.lane.b32.xlu0 %v2679_v22, %s2773_s21 }
 0x812   : > { %v2681_v23 = vpop.eup %2680 }
 0x813   : > { %1055 = vrot.lane.b32.xlu1 %v2681_v23, %s2773_s21 }
 0x881   : > { %v1031_v24 = vpop.permute.xlu0 %1030 }
 0x882   : > { %v1033_v25 = vmul.f32 %v2675_v10, %v1031_v24 }
 0x884   : > { %1060 = vrot.lane.b32.xlu0 %v1033_v25, %s2774_s22 }
 0x885   : > { %v1056_v26 = vpop.permute.xlu1 %1055 }
 0x886   : > { %v1058_v27 = vmul.f32 %v2677_v13, %v1056_v26 }
 0x888   : > { %1135 = vrot.lane.b32.xlu1 %v1058_v27, %s2774_s22 }
 0x8f6   : > { %v1061_v28 = vpop.permute.xlu0 %1060 }
 0x8f7   : > { %2494 = vmatmul.mubr.msk.f32.vlgmr.msra.gmra.mxu0 %vm441_vm2, %v1061_v28 }
 0x8f8   : > { %2508 = vmatpush3.msra.mxu0 %v2854_v32  ;;  %2515 = vmatprep.mubr.msk.f32.mxu0 %vm2772_vm1, %v2771_v34 }
 0x8f9   : > { %2509 = vmatprep.subr.mxu0 %v2771_v34 }
 0x8fa   : > { %v1136_v29 = vpop.permute.xlu1 %1135  ;;  %2510 = vmatpush3.msra.mxu0 %v2866_v35 }
 0x8fb   : > { %2505 = vmatmul.mubr.msk.f32.vlgmr.msra.gmra.mxu1 %vm441_vm2, %v1136_v29  ;;  %2511 = vmatprep.subr.mxu0 %v2771_v34 }
 0x8fc   : > { %2512 = vmatpush3.msra.mxu0 %v2880_v37  ;;  %2519 = vmatpush3.msra.mxu1 %v2859_v33 }
 0x8fd   : > { %2513 = vmatprep.subr.mxu0 %v2771_v34  ;;  %2520 = vmatprep.subr.mxu1 %v2771_v34 }
 0x8fe   : > { %2514 = vmatpush3.msra.mxu0 %v2894_v39  ;;  %2521 = vmatpush3.msra.mxu1 %v2871_v36 }
 0x8ff   : > { %2522 = vmatprep.subr.mxu1 %v2771_v34  ;;  %2526 = vmatprep.mubr.msk.f32.mxu1 %vm2772_vm1, %v2771_v34 }
 0x900   : > { %2523 = vmatpush3.msra.mxu1 %v2887_v38  ;;  %2529 = vmatprep.subr.mxu0 %v2771_v34 }
 0x901   : > { %2524 = vmatprep.subr.mxu1 %v2771_v34 }
 0x902   : > { %2525 = vmatpush3.msra.mxu1 %v2902_v40 }
 0x903   : > { %2540 = vmatprep.subr.mxu1 %v2771_v34 }
 0x9b7   : > { %v1130_v31 = vpop.f32.mrf.mxu0 }
 0x9b8   : > { %v1217_v41 = vadd.f32 %v1212_v30, %v1130_v31 }
 0x9b9   : > { %v2495_v42 = vpop.f32.mrf.mxu0 }
 0x9ba   : > { %2682 = vtanh.f32 %v1217_v41  ;;  %v2305_v49 = vmul.f32 -1.442695, %v1217_v41 }
 0x9bb   : > { %v1205_v44 = vpop.f32.mrf.mxu1 }
 0x9bc   : > { %v1242_v45 = vadd.f32 %v1216_v43, %v1205_v44 }
 0x9bd   : > { %v2506_v46 = vpop.f32.mrf.mxu1 }
 0x9be   : > { %2684 = vtanh.f32 %v1242_v45  ;;  %v2306_v50 = vmul.f32 -1.442695, %v1242_v45 }
 0x9bf   : > { %2686 = vpow2.f32 %v2305_v49 }
 0x9c0   : > { %2688 = vpow2.f32 %v2306_v50 }
 0x9c7   : > { %v2683_v47 = vpop.eup %2682 }
 0x9c8   : > { %1227 = vrot.lane.b32.xlu0 %v2683_v47, %s2773_s21 }
 0x9cb   : > { %v2685_v48 = vpop.eup %2684 }
 0x9cc   : > { %1252 = vrot.lane.b32.xlu1 %v2685_v48, %s2773_s21  ;;  %v2687_v51 = vpop.eup %2686 }
 0x9cd   : > { %v1221_v52 = vadd.f32 1.0, %v2687_v51  ;;  %v2689_v53 = vpop.eup %2688 }
 0x9ce   : > { %v1246_v54 = vadd.f32 1.0, %v2689_v53 }
 0x9cf   : > { %2690 = vrcp.f32 %v1221_v52 }
 0x9d0   : > { %2692 = vrcp.f32 %v1246_v54 }
 0x9dc   : > { %v2691_v55 = vpop.eup %2690 }
 0x9dd   : > { %v2693_v58 = vpop.eup %2692  ;;  %v1225_v61 = vmul.f32 %v2691_v55, %v3014_v18 }
 0x9de   : > { %v1250_v0 = vmul.f32 %v2693_v58, %v3018_v21 }
 0xa3a   : > { %v1228_v56 = vpop.permute.xlu0 %1227 }
 0xa3b   : > { %v1230_v57 = vmul.f32 %v2691_v55, %v1228_v56  ;;  %v1619_v56 = vld [vmem:[#allocation2 + $0x50] sm:$0xff] }
 0xa3d   : > { %1232 = vrot.lane.b32.xlu0 %v1230_v57, %s2774_s22 }
 0xa3e   : > { %v1253_v59 = vpop.permute.xlu1 %1252 }
 0xa3f   : > { %v1255_v60 = vmul.f32 %v2693_v58, %v1253_v59 }
 0xa41   : > { %1257 = vrot.lane.b32.xlu1 %v1255_v60, %s2774_s22  ;;  %v1620_v60 = vld [vmem:[#allocation2 + $0x28] sm:$0xff] }
 0xaaf   : > { %v1233_v62 = vpop.permute.xlu0 %1232 }
 0xab0   : > { %v3052_v63 = vadd.f32 %v1233_v62, %v1225_v61 }
 0xab2   : > { %2694 = vtanh.f32 %v3052_v63 }
 0xab3   : > { %v1258_v1 = vpop.permute.xlu1 %1257 }
 0xab4   : > { %v3056_v2 = vadd.f32 %v1258_v1, %v1250_v0 }
 0xab6   : > { %2696 = vtanh.f32 %v3056_v2 }
 0xabf   : > { %v2695_v3 = vpop.eup %2694 }
 0xac0   : > { %1238 = vrot.lane.b32.xlu0 %v2695_v3, %s2773_s21 }
 0xac3   : > { %v2697_v4 = vpop.eup %2696 }
 0xac4   : > { %1263 = vrot.lane.b32.xlu1 %v2697_v4, %s2773_s21 }
 0xb32   : > { %v1239_v5 = vpop.permute.xlu0 %1238 }
 0xb33   : > { %v1241_v6 = vmul.f32 %v2691_v55, %v1239_v5 }
 0xb35   : > { %1268 = vrot.lane.b32.xlu0 %v1241_v6, %s2774_s22 }
 0xb36   : > { %v1264_v7 = vpop.permute.xlu1 %1263 }
 0xb37   : > { %v1266_v8 = vmul.f32 %v2693_v58, %v1264_v7 }
 0xb39   : > { %1343 = vrot.lane.b32.xlu1 %v1266_v8, %s2774_s22 }
 0xba7   : > { %v1269_v9 = vpop.permute.xlu0 %1268 }
 0xba8   : > { %2516 = vmatmul.mubr.msk.f32.vlgmr.msra.gmra.mxu0 %vm441_vm2, %v1269_v9 }
 0xba9   : > { %2530 = vmatpush3.msra.mxu0 %v2854_v32  ;;  %2537 = vmatprep.mubr.msk.f32.mxu0 %vm2772_vm1, %v2771_v34 }
 0xbaa   : > { %2531 = vmatprep.subr.mxu0 %v2771_v34 }
 0xbab   : > { %v1344_v10 = vpop.permute.xlu1 %1343  ;;  %2532 = vmatpush3.msra.mxu0 %v2866_v35 }
 0xbac   : > { %2527 = vmatmul.mubr.msk.f32.vlgmr.msra.gmra.mxu1 %vm441_vm2, %v1344_v10  ;;  %2533 = vmatprep.subr.mxu0 %v2771_v34 }
 0xbad   : > { %2534 = vmatpush3.msra.mxu0 %v2880_v37  ;;  %2541 = vmatpush3.msra.mxu1 %v2859_v33 }
 0xbae   : > { %2535 = vmatprep.subr.mxu0 %v2771_v34  ;;  %2542 = vmatprep.subr.mxu1 %v2771_v34 }
 0xbaf   : > { %2536 = vmatpush3.msra.mxu0 %v2894_v39  ;;  %2543 = vmatpush3.msra.mxu1 %v2871_v36 }
 0xbb0   : > { %2544 = vmatprep.subr.mxu1 %v2771_v34  ;;  %2548 = vmatprep.mubr.msk.f32.mxu1 %vm2772_vm1, %v2771_v34 }
 0xbb1   : > { %2545 = vmatpush3.msra.mxu1 %v2887_v38  ;;  %2551 = vmatprep.subr.mxu0 %v2771_v34 }
 0xbb2   : > { %2546 = vmatprep.subr.mxu1 %v2771_v34 }
 0xbb3   : > { %2547 = vmatpush3.msra.mxu1 %v2902_v40 }
 0xbb4   : > { %2562 = vmatprep.subr.mxu1 %v2771_v34 }
 0xc68   : > { %v1338_v12 = vpop.f32.mrf.mxu0 }
 0xc69   : > { %v1419_v13 = vadd.f32 %v1417_v11, %v1338_v12 }
 0xc6a   : > { %v2517_v14 = vpop.f32.mrf.mxu0 }
 0xc6b   : > { %2698 = vtanh.f32 %v1419_v13  ;;  %v2309_v21 = vmul.f32 -1.442695, %v1419_v13 }
 0xc6c   : > { %v1413_v16 = vpop.f32.mrf.mxu1 }
 0xc6d   : > { %v1444_v17 = vadd.f32 %v1418_v15, %v1413_v16 }
 0xc6e   : > { %v2528_v18 = vpop.f32.mrf.mxu1 }
 0xc6f   : > { %2700 = vtanh.f32 %v1444_v17  ;;  %v2310_v22 = vmul.f32 -1.442695, %v1444_v17 }
 0xc70   : > { %2702 = vpow2.f32 %v2309_v21 }
 0xc71   : > { %2704 = vpow2.f32 %v2310_v22 }
 0xc78   : > { %v2699_v19 = vpop.eup %2698 }
 0xc79   : > { %1429 = vrot.lane.b32.xlu0 %v2699_v19, %s2773_s21 }
 0xc7c   : > { %v2701_v20 = vpop.eup %2700 }
 0xc7d   : > { %1454 = vrot.lane.b32.xlu1 %v2701_v20, %s2773_s21  ;;  %v2703_v23 = vpop.eup %2702 }
 0xc7e   : > { %v1423_v24 = vadd.f32 1.0, %v2703_v23  ;;  %v2705_v25 = vpop.eup %2704 }
 0xc7f   : > { %v1448_v26 = vadd.f32 1.0, %v2705_v25 }
 0xc80   : > { %2706 = vrcp.f32 %v1423_v24 }
 0xc81   : > { %2708 = vrcp.f32 %v1448_v26 }
 0xc8d   : > { %v2707_v27 = vpop.eup %2706 }
 0xc8e   : > { %v2709_v30 = vpop.eup %2708  ;;  %v1427_v42 = vmul.f32 %v2707_v27, %v3052_v63 }
 0xc8f   : > { %v1452_v45 = vmul.f32 %v2709_v30, %v3056_v2 }
 0xceb   : > { %v1430_v28 = vpop.permute.xlu0 %1429 }
 0xcec   : > { %v1432_v29 = vmul.f32 %v2707_v27, %v1430_v28 }
 0xcee   : > { %1434 = vrot.lane.b32.xlu0 %v1432_v29, %s2774_s22 }
 0xcef   : > { %v1455_v31 = vpop.permute.xlu1 %1454 }
 0xcf0   : > { %v1457_v41 = vmul.f32 %v2709_v30, %v1455_v31 }
 0xcf2   : > { %1459 = vrot.lane.b32.xlu1 %v1457_v41, %s2774_s22 }
 0xd60   : > { %v1435_v43 = vpop.permute.xlu0 %1434 }
 0xd61   : > { %v3090_v44 = vadd.f32 %v1435_v43, %v1427_v42 }
 0xd63   : > { %2710 = vtanh.f32 %v3090_v44 }
 0xd64   : > { %v1460_v46 = vpop.permute.xlu1 %1459 }
 0xd65   : > { %v3094_v47 = vadd.f32 %v1460_v46, %v1452_v45 }
 0xd67   : > { %2712 = vtanh.f32 %v3094_v47 }
 0xd70   : > { %v2711_v48 = vpop.eup %2710 }
 0xd71   : > { %1440 = vrot.lane.b32.xlu0 %v2711_v48, %s2773_s21 }
 0xd74   : > { %v2713_v49 = vpop.eup %2712 }
 0xd75   : > { %1465 = vrot.lane.b32.xlu1 %v2713_v49, %s2773_s21 }
 0xde3   : > { %v1441_v50 = vpop.permute.xlu0 %1440 }
 0xde4   : > { %v1443_v51 = vmul.f32 %v2707_v27, %v1441_v50 }
 0xde6   : > { %1470 = vrot.lane.b32.xlu0 %v1443_v51, %s2774_s22 }
 0xde7   : > { %v1466_v52 = vpop.permute.xlu1 %1465 }
 0xde8   : > { %v1468_v53 = vmul.f32 %v2709_v30, %v1466_v52 }
 0xdea   : > { %1545 = vrot.lane.b32.xlu1 %v1468_v53, %s2774_s22 }
 0xe58   : > { %v1471_v54 = vpop.permute.xlu0 %1470 }
 0xe59   : > { %2538 = vmatmul.mubr.msk.f32.vlgmr.msra.gmra.mxu0 %vm441_vm2, %v1471_v54 }
 0xe5a   : > { %2552 = vmatpush3.msra.mxu0 %v2854_v32  ;;  %2559 = vmatprep.mubr.msk.f32.mxu0 %vm2772_vm1, %v2771_v34 }
 0xe5b   : > { %2553 = vmatprep.subr.mxu0 %v2771_v34 }
 0xe5c   : > { %v1546_v55 = vpop.permute.xlu1 %1545  ;;  %2554 = vmatpush3.msra.mxu0 %v2866_v35 }
 0xe5d   : > { %2549 = vmatmul.mubr.msk.f32.vlgmr.msra.gmra.mxu1 %vm441_vm2, %v1546_v55  ;;  %2555 = vmatprep.subr.mxu0 %v2771_v34 }
 0xe5e   : > { %2556 = vmatpush3.msra.mxu0 %v2880_v37  ;;  %2563 = vmatpush3.msra.mxu1 %v2859_v33 }
 0xe5f   : > { %2557 = vmatprep.subr.mxu0 %v2771_v34  ;;  %2564 = vmatprep.subr.mxu1 %v2771_v34 }
 0xe60   : > { %2558 = vmatpush3.msra.mxu0 %v2894_v39  ;;  %2565 = vmatpush3.msra.mxu1 %v2871_v36 }
 0xe61   : > { %2566 = vmatprep.subr.mxu1 %v2771_v34  ;;  %2570 = vmatprep.mubr.msk.f32.mxu1 %vm2772_vm1, %v2771_v34 }
 0xe62   : > { %2567 = vmatpush3.msra.mxu1 %v2887_v38  ;;  %2573 = vmatprep.subr.mxu0 %v2771_v34 }
 0xe63   : > { %2568 = vmatprep.subr.mxu1 %v2771_v34 }
 0xe64   : > { %2569 = vmatpush3.msra.mxu1 %v2902_v40 }
 0xe65   : > { %2584 = vmatprep.subr.mxu1 %v2771_v34 }
 0xf19   : > { %v1540_v57 = vpop.f32.mrf.mxu0 }
 0xf1a   : > { %v1621_v58 = vadd.f32 %v1619_v56, %v1540_v57 }
 0xf1b   : > { %v2539_v59 = vpop.f32.mrf.mxu0 }
 0xf1c   : > { %2714 = vtanh.f32 %v1621_v58  ;;  %v2313_v2 = vmul.f32 -1.442695, %v1621_v58 }
 0xf1d   : > { %v1615_v61 = vpop.f32.mrf.mxu1 }
 0xf1e   : > { %v1646_v62 = vadd.f32 %v1620_v60, %v1615_v61 }
 0xf1f   : > { %v2550_v63 = vpop.f32.mrf.mxu1 }
 0xf20   : > { %2716 = vtanh.f32 %v1646_v62  ;;  %v2314_v3 = vmul.f32 -1.442695, %v1646_v62 }
 0xf21   : > { %2718 = vpow2.f32 %v2313_v2 }
 0xf22   : > { %2720 = vpow2.f32 %v2314_v3 }
 0xf29   : > { %v2715_v0 = vpop.eup %2714 }
 0xf2a   : > { %1631 = vrot.lane.b32.xlu0 %v2715_v0, %s2773_s21 }
 0xf2d   : > { %v2717_v1 = vpop.eup %2716 }
 0xf2e   : > { %1656 = vrot.lane.b32.xlu1 %v2717_v1, %s2773_s21  ;;  %v2719_v4 = vpop.eup %2718  ;;  %v2023_v1 = vld [vmem:[#allocation2 + $0x70] sm:$0xff] }
 0xf2f   : > { %v1625_v5 = vadd.f32 1.0, %v2719_v4  ;;  %v2721_v6 = vpop.eup %2720 }
 0xf30   : > { %v1650_v7 = vadd.f32 1.0, %v2721_v6 }
 0xf31   : > { %2722 = vrcp.f32 %v1625_v5  ;;  %v2024_v5 = vld [vmem:[#allocation2 + $0x8] sm:$0xff] }
 0xf32   : > { %2724 = vrcp.f32 %v1650_v7 }
 0xf3e   : > { %v2723_v8 = vpop.eup %2722 }
 0xf3f   : > { %v2725_v11 = vpop.eup %2724  ;;  %v1629_v14 = vmul.f32 %v2723_v8, %v3090_v44 }
 0xf40   : > { %v1654_v17 = vmul.f32 %v2725_v11, %v3094_v47 }
 0xf9c   : > { %v1632_v9 = vpop.permute.xlu0 %1631 }
 0xf9d   : > { %v1634_v10 = vmul.f32 %v2723_v8, %v1632_v9 }
 0xf9f   : > { %1636 = vrot.lane.b32.xlu0 %v1634_v10, %s2774_s22 }
 0xfa0   : > { %v1657_v12 = vpop.permute.xlu1 %1656 }
 0xfa1   : > { %v1659_v13 = vmul.f32 %v2725_v11, %v1657_v12 }
 0xfa3   : > { %1661 = vrot.lane.b32.xlu1 %v1659_v13, %s2774_s22 }
0x1011   : > { %v1637_v15 = vpop.permute.xlu0 %1636 }
0x1012   : > { %v3128_v16 = vadd.f32 %v1637_v15, %v1629_v14 }
0x1014   : > { %2726 = vtanh.f32 %v3128_v16 }
0x1015   : > { %v1662_v18 = vpop.permute.xlu1 %1661 }
0x1016   : > { %v3132_v19 = vadd.f32 %v1662_v18, %v1654_v17 }
0x1018   : > { %2728 = vtanh.f32 %v3132_v19 }
0x1021   : > { %v2727_v20 = vpop.eup %2726 }
0x1022   : > { %1642 = vrot.lane.b32.xlu0 %v2727_v20, %s2773_s21 }
0x1025   : > { %v2729_v21 = vpop.eup %2728 }
0x1026   : > { %1667 = vrot.lane.b32.xlu1 %v2729_v21, %s2773_s21 }
0x1094   : > { %v1643_v22 = vpop.permute.xlu0 %1642 }
0x1095   : > { %v1645_v23 = vmul.f32 %v2723_v8, %v1643_v22 }
0x1097   : > { %1672 = vrot.lane.b32.xlu0 %v1645_v23, %s2774_s22 }
0x1098   : > { %v1668_v24 = vpop.permute.xlu1 %1667 }
0x1099   : > { %v1670_v25 = vmul.f32 %v2725_v11, %v1668_v24 }
0x109b   : > { %1747 = vrot.lane.b32.xlu1 %v1670_v25, %s2774_s22 }
0x1109   : > { %v1673_v26 = vpop.permute.xlu0 %1672 }
0x110a   : > { %2560 = vmatmul.mubr.msk.f32.vlgmr.msra.gmra.mxu0 %vm441_vm2, %v1673_v26 }
0x110b   : > { %2574 = vmatpush3.msra.mxu0 %v2854_v32  ;;  %2581 = vmatprep.mubr.msk.f32.mxu0 %vm2772_vm1, %v2771_v34  ;;  %v1821_v32 = vld [vmem:[#allocation2 + $0x60] sm:$0xff] }
0x110c   : > { %2575 = vmatprep.subr.mxu0 %v2771_v34 }
0x110d   : > { %v1748_v27 = vpop.permute.xlu1 %1747  ;;  %2576 = vmatpush3.msra.mxu0 %v2866_v35 }
0x110e   : > { %2571 = vmatmul.mubr.msk.f32.vlgmr.msra.gmra.mxu1 %vm441_vm2, %v1748_v27  ;;  %2577 = vmatprep.subr.mxu0 %v2771_v34 }
0x110f   : > { %2578 = vmatpush3.msra.mxu0 %v2880_v37  ;;  %2585 = vmatpush3.msra.mxu1 %v2859_v33 }
0x1110   : > { %2579 = vmatprep.subr.mxu0 %v2771_v34  ;;  %2586 = vmatprep.subr.mxu1 %v2771_v34 }
0x1111   : > { %2580 = vmatpush3.msra.mxu0 %v2894_v39  ;;  %2587 = vmatpush3.msra.mxu1 %v2871_v36  ;;  %v1822_v36 = vld [vmem:[#allocation2 + $0x18] sm:$0xff] }
0x1112   : > { %2588 = vmatprep.subr.mxu1 %v2771_v34  ;;  %2592 = vmatprep.mubr.msk.f32.mxu1 %vm2772_vm1, %v2771_v34 }
0x1113   : > { %2589 = vmatpush3.msra.mxu1 %v2887_v38  ;;  %2595 = vmatprep.subr.mxu0 %v2771_v34 }
0x1114   : > { %2590 = vmatprep.subr.mxu1 %v2771_v34 }
0x1115   : > { %2591 = vmatpush3.msra.mxu1 %v2902_v40 }
0x1116   : > { %2606 = vmatprep.subr.mxu1 %v2771_v34 }
0x11ca   : > { %v1742_v33 = vpop.f32.mrf.mxu0 }
0x11cb   : > { %v1823_v35 = vadd.f32 %v1821_v32, %v1742_v33  ;;  %v2078_v33 = vld [vmem:[%s3232_s5 + $0x18] sm:$0xff] }
0x11cc   : > { %v2561_v37 = vpop.f32.mrf.mxu0 }
0x11cd   : > { %2730 = vtanh.f32 %v1823_v35  ;;  %v2317_v31 = vmul.f32 -1.442695, %v1823_v35  ;;  %v2077_v35 = vld [vmem:[%s3232_s5 + $0x10] sm:$0xff]  ;;  %v2082_v37 = vld [vmem:[%s3233_s6 + $0x18] sm:$0xff] }
0x11ce   : > { %v1817_v39 = vpop.f32.mrf.mxu1 }
0x11cf   : > { %v1848_v28 = vadd.f32 %v1822_v36, %v1817_v39  ;;  %v2081_v36 = vld [vmem:[%s3233_s6 + $0x10] sm:$0xff]  ;;  %v2076_v39 = vld [vmem:[%s3232_s5 + $0x8] sm:$0xff] }
0x11d0   : > { %v2572_v29 = vpop.f32.mrf.mxu1 }
0x11d1   : > { %2732 = vtanh.f32 %v1848_v28  ;;  %v2318_v40 = vmul.f32 -1.442695, %v1848_v28  ;;  %v2075_v28 = vld [vmem:[%s3232_s5] sm:$0xff] }
0x11d2   : > { %2734 = vpow2.f32 %v2317_v31  ;;  %v2079_v31 = vld [vmem:[%s3233_s6] sm:$0xff] }
0x11d3   : > { %2736 = vpow2.f32 %v2318_v40 }
0x11da   : > { %v2731_v30 = vpop.eup %2730 }
0x11db   : > { %1833 = vrot.lane.b32.xlu0 %v2731_v30, %s2773_s21 }
0x11de   : > { %v2733_v38 = vpop.eup %2732 }
0x11df   : > { %1858 = vrot.lane.b32.xlu1 %v2733_v38, %s2773_s21  ;;  %v2735_v41 = vpop.eup %2734  ;;  %v2080_v38 = vld [vmem:[%s3233_s6 + $0x8] sm:$0xff] }
0x11e0   : > { %v1827_v42 = vadd.f32 1.0, %v2735_v41  ;;  %v2737_v43 = vpop.eup %2736 }
0x11e1   : > { %v1852_v44 = vadd.f32 1.0, %v2737_v43 }
0x11e2   : > { %2738 = vrcp.f32 %v1827_v42 }
0x11e3   : > { %2740 = vrcp.f32 %v1852_v44 }
0x11ef   : > { %v2739_v45 = vpop.eup %2738 }
0x11f0   : > { %v2741_v48 = vpop.eup %2740  ;;  %v1831_v51 = vmul.f32 %v2739_v45, %v3128_v16 }
0x11f1   : > { %v1856_v54 = vmul.f32 %v2741_v48, %v3132_v19 }
0x124d   : > { %v1834_v46 = vpop.permute.xlu0 %1833 }
0x124e   : > { %v1836_v47 = vmul.f32 %v2739_v45, %v1834_v46 }
0x1250   : > { %1838 = vrot.lane.b32.xlu0 %v1836_v47, %s2774_s22 }
0x1251   : > { %v1859_v49 = vpop.permute.xlu1 %1858 }
0x1252   : > { %v1861_v50 = vmul.f32 %v2741_v48, %v1859_v49 }
0x1254   : > { %1863 = vrot.lane.b32.xlu1 %v1861_v50, %s2774_s22 }
0x12c2   : > { %v1839_v52 = vpop.permute.xlu0 %1838 }
0x12c3   : > { %v1841_v53 = vadd.f32 %v1839_v52, %v1831_v51 }
0x12c5   : > { %2742 = vtanh.f32 %v1841_v53 }
0x12c6   : > { %v1864_v55 = vpop.permute.xlu1 %1863 }
0x12c7   : > { %v1866_v56 = vadd.f32 %v1864_v55, %v1856_v54 }
0x12c9   : > { %2744 = vtanh.f32 %v1866_v56 }
0x12d2   : > { %v2743_v57 = vpop.eup %2742 }
0x12d3   : > { %1844 = vrot.lane.b32.xlu0 %v2743_v57, %s2773_s21 }
0x12d6   : > { %v2745_v58 = vpop.eup %2744 }
0x12d7   : > { %1869 = vrot.lane.b32.xlu1 %v2745_v58, %s2773_s21 }
0x1345   : > { %v1845_v59 = vpop.permute.xlu0 %1844 }
0x1346   : > { %v1847_v60 = vmul.f32 %v2739_v45, %v1845_v59 }
0x1348   : > { %1874 = vrot.lane.b32.xlu0 %v1847_v60, %s2774_s22 }
0x1349   : > { %v1870_v61 = vpop.permute.xlu1 %1869 }
0x134a   : > { %v1872_v62 = vmul.f32 %v2741_v48, %v1870_v61 }
0x134c   : > { %1949 = vrot.lane.b32.xlu1 %v1872_v62, %s2774_s22 }
0x13ba   : > { %v1875_v63 = vpop.permute.xlu0 %1874 }
0x13bb   : > { %2582 = vmatmul.mubr.msk.f32.vlgmr.msra.gmra.mxu0 %vm441_vm2, %v1875_v63 }
0x13bc   : > { %2603 = vmatprep.mubr.msk.f32.mxu0 %vm2772_vm1, %v2771_v34  ;;  %2596 = vmatpush3.msra.mxu0 %v2082_v37 }
0x13bd   : > { %2597 = vmatprep.subr.mxu0 %v2771_v34 }
0x13be   : > { %v1950_v0 = vpop.permute.xlu1 %1949  ;;  %2598 = vmatpush3.msra.mxu0 %v2081_v36 }
0x13bf   : > { %2593 = vmatmul.mubr.msk.f32.vlgmr.msra.gmra.mxu1 %vm441_vm2, %v1950_v0  ;;  %2599 = vmatprep.subr.mxu0 %v2771_v34 }
0x13c0   : > { %2614 = vmatprep.mubr.msk.f32.mxu1 %vm2772_vm1, %v2771_v34  ;;  %2607 = vmatpush3.msra.mxu1 %v2078_v33 }
0x13c1   : > { %2608 = vmatprep.subr.mxu1 %v2771_v34  ;;  %2600 = vmatpush3.msra.mxu0 %v2080_v38 }
0x13c2   : > { %2609 = vmatpush3.msra.mxu1 %v2077_v35  ;;  %2601 = vmatprep.subr.mxu0 %v2771_v34 }
0x13c3   : > { %2610 = vmatprep.subr.mxu1 %v2771_v34  ;;  %2602 = vmatpush3.msra.mxu0 %v2079_v31 }
0x13c4   : > { %2611 = vmatpush3.msra.mxu1 %v2076_v39 }
0x13c5   : > { %2612 = vmatprep.subr.mxu1 %v2771_v34  ;;  %v2325_v34 = vld [vmem:[%s3234_s7] ss:$0 sm:$0xff] }
0x13c6   : > { %2613 = vmatpush3.msra.mxu1 %v2075_v28 }
0x147b   : > { %v1944_v2 = vpop.f32.mrf.mxu0 }
0x147c   : > { %v2025_v3 = vadd.f32 %v2023_v1, %v1944_v2 }
0x147d   : > { %v2583_v4 = vpop.f32.mrf.mxu0 }
0x147e   : > { %2746 = vtanh.f32 %v2025_v3  ;;  %v2321_v11 = vmul.f32 -1.442695, %v2025_v3 }
0x147f   : > { %v2019_v6 = vpop.f32.mrf.mxu1 }
0x1480   : > { %v2050_v7 = vadd.f32 %v2024_v5, %v2019_v6 }
0x1481   : > { %v2594_v8 = vpop.f32.mrf.mxu1 }
0x1482   : > { %2748 = vtanh.f32 %v2050_v7  ;;  %v2322_v12 = vmul.f32 -1.442695, %v2050_v7 }
0x1483   : > { %2750 = vpow2.f32 %v2321_v11 }
0x1484   : > { %2752 = vpow2.f32 %v2322_v12 }
0x148b   : > { %v2747_v9 = vpop.eup %2746 }
0x148c   : > { %2035 = vrot.lane.b32.xlu0 %v2747_v9, %s2773_s21 }
0x148f   : > { %v2749_v10 = vpop.eup %2748 }
0x1490   : > { %2060 = vrot.lane.b32.xlu1 %v2749_v10, %s2773_s21  ;;  %v2751_v13 = vpop.eup %2750 }
0x1491   : > { %v2029_v14 = vadd.f32 1.0, %v2751_v13  ;;  %v2753_v15 = vpop.eup %2752 }
0x1492   : > { %v2054_v16 = vadd.f32 1.0, %v2753_v15 }
0x1493   : > { %2754 = vrcp.f32 %v2029_v14 }
0x1494   : > { %2756 = vrcp.f32 %v2054_v16 }
0x14a0   : > { %v2755_v17 = vpop.eup %2754 }
0x14a1   : > { %v2757_v20 = vpop.eup %2756  ;;  %v2033_v23 = vmul.f32 %v2755_v17, %v1841_v53 }
0x14a2   : > { %v2058_v26 = vmul.f32 %v2757_v20, %v1866_v56 }
0x14fe   : > { %v2036_v18 = vpop.permute.xlu0 %2035 }
0x14ff   : > { %v2038_v19 = vmul.f32 %v2755_v17, %v2036_v18 }
0x1501   : > { %2040 = vrot.lane.b32.xlu0 %v2038_v19, %s2774_s22 }
0x1502   : > { %v2061_v21 = vpop.permute.xlu1 %2060 }
0x1503   : > { %v2063_v22 = vmul.f32 %v2757_v20, %v2061_v21 }
0x1505   : > { %2065 = vrot.lane.b32.xlu1 %v2063_v22, %s2774_s22 }
0x1573   : > { %v2041_v24 = vpop.permute.xlu0 %2040 }
0x1574   : > { %v2043_v25 = vadd.f32 %v2041_v24, %v2033_v23 }
0x1576   : > { %2758 = vtanh.f32 %v2043_v25 }
0x1577   : > { %v2066_v27 = vpop.permute.xlu1 %2065 }
0x1578   : > { %v2068_v32 = vadd.f32 %v2066_v27, %v2058_v26 }
0x157a   : > { %2760 = vtanh.f32 %v2068_v32 }
0x1583   : > { %v2759_v29 = vpop.eup %2758 }
0x1584   : > { %2046 = vrot.lane.b32.xlu0 %v2759_v29, %s2773_s21 }
0x1587   : > { %v2761_v30 = vpop.eup %2760 }
0x1588   : > { %2071 = vrot.lane.b32.xlu1 %v2761_v30, %s2773_s21 }
0x15f6   : > { %v2047_v40 = vpop.permute.xlu0 %2046 }
0x15f7   : > { %v2049_v41 = vmul.f32 %v2755_v17, %v2047_v40 }
0x15f9   : > { %2159 = vrot.lane.b32.xlu1 %v2049_v41, %s2774_s22 }
0x15fa   : > { %v2072_v42 = vpop.permute.xlu1 %2071 }
0x15fb   : > { %v2074_v43 = vmul.f32 %v2757_v20, %v2072_v42 }
0x15fd   : > { %2084 = vrot.lane.b32.xlu0 %v2074_v43, %s2774_s22 }
0x166b   : > { %v2160_v44 = vpop.permute.xlu1 %2159 }
0x166c   : > { %2615 = vmatmul.mubr.msk.f32.vlgmr.msra.gmra.mxu1 %vm441_vm2, %v2160_v44 }
0x166f   : > { %v2085_v45 = vpop.permute.xlu0 %2084 }
0x1670   : > { %2604 = vmatmul.mubr.msk.f32.vlgmr.msra.gmra.mxu0 %vm441_vm2, %v2085_v45 }
0x172c   : > { %v2229_v46 = vpop.f32.mrf.mxu1 }
0x172e   : > { %v2616_v47 = vpop.f32.mrf.mxu1 }
0x1730   : > { %v2154_v48 = vpop.f32.mrf.mxu0 }
0x1731   : > { %v2230_v49 = vadd.f32 %v2229_v46, %v2154_v48 }
0x1732   : > { %v2605_v50 = vpop.f32.mrf.mxu0 }
0x1733   : > { %v2240_v51 = vadd.f32 %v2325_v34, %v2230_v49 }
0x1735   : > { %2241 = vst.msk [vmem:[%s3235_s8] sm:$0xff] %vm441_vm2, %v2240_v51 }
0x1736 PF: > { %s18_s27 = sadd.s32 1, %s2768_s27  }
0x1737   : > { %p15_p5 = scmp.ge.s32.totalorder %s18_s27, 4  }
0x1739   :  { %17 = sbr.rel (!%p15_p5) target bundleno = 1 (0x1), region = 91 }

</bundles_post_ra>
